<compile_context>
chip_gen: v7x
topology: tpu7x:2x2x1
jax: 0.10.0
libtpu: 0.0.40
codegen_flags: <defaults>
</compile_context>

<pallas_src>
import jax
import jax.numpy as jnp
from jax.experimental import pallas as pl
from jax.experimental.pallas import tpu as pltpu

KERNEL_SIZES = (2, 3, 4, 5)
K_MIN = KERNEL_SIZES[0]
K_MAX = KERNEL_SIZES[-1]
CHANNEL_OUT = 10
NPAD = 128                      # lane-dense channel / feature padding


def cnnreg_kernel(embed_ref, wpack_ref, bpack_ref, mask_ref,
                  w1_ref, b1_ref, w2_ref, b2_ref, out_ref):
    emb = embed_ref[...]                          # [Bt, Lp, E]
    Bt, Lp, E = emb.shape
    T = Lp - (K_MAX - 1)                          # = L - K_MIN + 1 window positions

    # Single unfold with the widest kernel (5 rows per window).  Concatenating
    # the 5 shifted slices along the last dim matches the row-major
    # (kernel_row, embed) flattening used for the packed conv weight.
    windows = jnp.concatenate([emb[:, j:j + T, :] for j in range(K_MAX)],
                              axis=-1)                           # [Bt, T, 5*E]
    x2d = windows.reshape(Bt * T, K_MAX * E)

    # One fused conv matmul for all four kernel sizes (N padded to 128 lanes).
    conv = jnp.dot(x2d, wpack_ref[...],
                   preferred_element_type=jnp.float32) + bpack_ref[...]
    act = jnp.maximum(conv, 0.0)                                 # ReLU
    act = act.reshape(Bt, T, NPAD) * mask_ref[...]               # zero invalid tails per k
    feats = jnp.max(act, axis=1)                                 # max_pool1d over time -> [Bt, 128]

    # TODO(synk): nn.Dropout is stochastic only in training; identity here.
    h = jnp.dot(feats, w1_ref[...],
                preferred_element_type=jnp.float32) + b1_ref[...]    # linear1 -> [Bt, 128]
    h = jnp.maximum(h, 0.0)

    # linear2 (10 -> 1) on the VPU/XLU: elementwise multiply + lane reduction,
    # then broadcast across lanes so the store stays lane-dense (no vst.msk).
    y = jnp.sum(h * w2_ref[...], axis=-1, keepdims=True) + b2_ref[...]   # [Bt, 1]
    out_ref[...] = jnp.broadcast_to(y, out_ref.shape).astype(out_ref.dtype)


def _round_up(x, m):
    return ((x + m - 1) // m) * m


def cnnreg_forward(tokens, params, *, block_b=256, conv_bf16=False):
    """tokens: int32 [B, maxlen]; params: dict of weights.  Returns [B, 1] f32."""
    emb_table = params["embedding"]               # [vocab, E]
    B, L = tokens.shape
    E = emb_table.shape[1]
    C = CHANNEL_OUT
    assert L >= K_MAX, "maxlen must be >= largest conv kernel size (5)"

    T = L - K_MIN + 1
    Lp = L + (K_MAX - K_MIN)                      # zero rows so 5-row windows exist at every t

    # --- glue: embedding gather + time padding --------------------------------
    # TODO(synk): the gather could be fused into the kernel (jnp.take on a
    # VMEM-resident table) to avoid materializing embed in HBM for large B.
    embed = jnp.take(emb_table, tokens, axis=0)   # [B, L, E]
    embed = jnp.pad(embed, ((0, 0), (0, Lp - L), (0, 0)))

    # --- pack the four conv weights into one lane-dense matrix ----------------
    wpack = jnp.zeros((K_MAX * E, NPAD), jnp.float32)
    bpack = jnp.zeros((1, NPAD), jnp.float32)
    mask = jnp.zeros((1, T, NPAD), jnp.float32)
    t_idx = jnp.arange(T)
    for i, k in enumerate(KERNEL_SIZES):
        w = params[f"conv{k}_w"].reshape(C, k * E).T            # torch [C,1,k,E] -> [k*E, C]
        wpack = wpack.at[:k * E, i * C:(i + 1) * C].set(w)
        bpack = bpack.at[0, i * C:(i + 1) * C].set(params[f"conv{k}_b"])
        valid = (t_idx <= (L - k)).astype(jnp.float32)          # valid window positions for k
        mask = mask.at[0, :, i * C:(i + 1) * C].set(
            jnp.broadcast_to(valid[:, None], (T, C)))

    n_feat = C * len(KERNEL_SIZES)                              # 40
    w1 = jnp.zeros((NPAD, NPAD), jnp.float32).at[:n_feat, :10].set(params["linear1_w"].T)
    b1 = jnp.zeros((1, NPAD), jnp.float32).at[0, :10].set(params["linear1_b"])
    w2 = jnp.zeros((1, NPAD), jnp.float32).at[0, :10].set(params["linear2_w"].reshape(-1))
    b2 = params["linear2_b"].reshape(1, 1).astype(jnp.float32)

    if conv_bf16:
        # Optional (mainly v6e): halve embed HBM bytes; accumulation stays f32.
        embed = embed.astype(jnp.bfloat16)
        wpack = wpack.astype(jnp.bfloat16)

    # --- batch grid ------------------------------------------------------------
    # Round the batch block up to a multiple of 8 so the [bb, 128] output block
    # is (8,128)-tile aligned (no partial-sublane stores) even for tiny B.
    bb = min(block_b, _round_up(B, 8))
    pad_b = (-B) % bb
    if pad_b:
        embed = jnp.pad(embed, ((0, pad_b), (0, 0), (0, 0)))
    Bp = B + pad_b

    def full_spec(a):
        nd = a.ndim
        return pl.BlockSpec(a.shape, lambda b: (0,) * nd)       # stays VMEM-resident

    out = pl.pallas_call(
        cnnreg_kernel,
        out_shape=jax.ShapeDtypeStruct((Bp, NPAD), jnp.float32),
        grid=(Bp // bb,),
        in_specs=[
            pl.BlockSpec((bb, Lp, E), lambda b: (b, 0, 0)),     # embed tiled over batch
            full_spec(wpack), full_spec(bpack), full_spec(mask),
            full_spec(w1), full_spec(b1), full_spec(w2), full_spec(b2),
        ],
        out_specs=pl.BlockSpec((bb, NPAD), lambda b: (b, 0)),
        compiler_params=pltpu.CompilerParams(
            dimension_semantics=("parallel",)),                 # megacore / v7x 2-TC sharding
    )(embed, wpack, bpack, mask, w1, b1, w2, b2)

    return out[:B, :1]                            # lane 0 holds the regression output


def cnnreg_reference(tokens, params):
    """Pure-JAX mirror of the PyTorch forward, for correctness checking."""
    embed = jnp.take(params["embedding"], tokens, axis=0)       # [B, L, E]
    L = tokens.shape[1]
    pooled = []
    for k in KERNEL_SIZES:
        w = params[f"conv{k}_w"][:, 0]                          # [C, k, E]
        b = params[f"conv{k}_b"]
        T = L - k + 1
        windows = jnp.stack([embed[:, t:t + k, :] for t in range(T)], axis=1)  # [B,T,k,E]
        conv = jnp.einsum("btke,cke->btc", windows, w,
                          precision=jax.lax.Precision.HIGHEST) + b
        pooled.append(jnp.max(jnp.maximum(conv, 0.0), axis=1))  # [B, C]
    feats = jnp.concatenate(pooled, axis=-1)                    # [B, 40]
    h = jnp.maximum(feats @ params["linear1_w"].T + params["linear1_b"], 0.0)
    return h @ params["linear2_w"].T + params["linear2_b"]      # [B, 1]


def init_params(key, vocab, embedding_dim):
    ks = jax.random.split(key, 12)
    p = {}
    p["embedding"] = jax.random.normal(ks[0], (vocab, embedding_dim), jnp.float32)
    for i, k in enumerate(KERNEL_SIZES):
        fan_in = 1 * k * embedding_dim
        bound = 1.0 / jnp.sqrt(fan_in)
        p[f"conv{k}_w"] = jax.random.uniform(
            ks[1 + 2 * i], (CHANNEL_OUT, 1, k, embedding_dim), jnp.float32,
            -bound, bound)
        p[f"conv{k}_b"] = jax.random.uniform(
            ks[2 + 2 * i], (CHANNEL_OUT,), jnp.float32, -bound, bound)
    n_feat = CHANNEL_OUT * len(KERNEL_SIZES)        # 40
    b1 = 1.0 / jnp.sqrt(n_feat)
    p["linear1_w"] = jax.random.uniform(ks[9], (10, n_feat), jnp.float32, -b1, b1)
    p["linear1_b"] = jax.random.uniform(ks[10], (10,), jnp.float32, -b1, b1)
    b2 = 1.0 / jnp.sqrt(10.0)
    p["linear2_w"] = jax.random.uniform(ks[11], (1, 10), jnp.float32, -b2, b2)
    p["linear2_b"] = jnp.zeros((1,), jnp.float32)
    return p


if __name__ == "__main__":
    # Small shapes consistent with CNNReg(length=50, embedding_dim=16, maxlen=16)
    VOCAB, EMBED_DIM, MAXLEN, BATCH = 50, 16, 16, 2

    key = jax.random.PRNGKey(0)
    pkey, tkey = jax.random.split(key)
    params = init_params(pkey, VOCAB, EMBED_DIM)

    # Stand-in for `continuous(d, maxlen)`: already-padded token id matrix.
    tokens = jax.random.randint(tkey, (BATCH, MAXLEN), 0, VOCAB, dtype=jnp.int32)

    out = cnnreg_forward(tokens, params)
    out = jax.block_until_ready(out)
    assert out.shape == (BATCH, 1) and out.dtype == jnp.float32

    ref = jax.block_until_ready(cnnreg_reference(tokens, params))
    assert jnp.allclose(out, ref, rtol=1e-2, atol=1e-2), (out, ref)

    print("KERNEL_OK")
</pallas_src>

<mosaic_0001>
module attributes {stable_mosaic.version = 11 : i64} {
  func.func @cnnreg_kernel(%arg0: i32, %arg1: memref<8x19x16xf32, #tpu.memory_space<vmem>>, %arg2: memref<80x128xf32, #tpu.memory_space<vmem>>, %arg3: memref<1x128xf32, #tpu.memory_space<vmem>>, %arg4: memref<1x15x128xf32, #tpu.memory_space<vmem>>, %arg5: memref<128x128xf32, #tpu.memory_space<vmem>>, %arg6: memref<1x128xf32, #tpu.memory_space<vmem>>, %arg7: memref<1x128xf32, #tpu.memory_space<vmem>>, %arg8: memref<1x1xf32, #tpu.memory_space<vmem>>, %arg9: memref<8x128xf32, #tpu.memory_space<vmem>>) attributes {dimension_semantics = [#tpu.dimension_semantics<parallel>], iteration_bounds = array<i64: 1>, scalar_prefetch = 0 : i64, scratch_operands = 0 : i64, tpu.core_type = #tpu.core_type<tc>, window_params = [{transform_indices = @transform_0, window_bounds = array<i64: 8, 19, 16>}, {pipeline_mode = #tpu.pipeline_mode<synchronous>, transform_indices = @transform_1, window_bounds = array<i64: 80, 128>}, {pipeline_mode = #tpu.pipeline_mode<synchronous>, transform_indices = @transform_2, window_bounds = array<i64: 1, 128>}, {pipeline_mode = #tpu.pipeline_mode<synchronous>, transform_indices = @transform_3, window_bounds = array<i64: 1, 15, 128>}, {pipeline_mode = #tpu.pipeline_mode<synchronous>, transform_indices = @transform_4, window_bounds = array<i64: 128, 128>}, {pipeline_mode = #tpu.pipeline_mode<synchronous>, transform_indices = @transform_5, window_bounds = array<i64: 1, 128>}, {pipeline_mode = #tpu.pipeline_mode<synchronous>, transform_indices = @transform_6, window_bounds = array<i64: 1, 128>}, {pipeline_mode = #tpu.pipeline_mode<synchronous>, transform_indices = @transform_7, window_bounds = array<i64: 1, 1>}, {transform_indices = @transform_8, window_bounds = array<i64: 8, 128>}]} {
    %c0 = arith.constant 0 : index
    %c0_0 = arith.constant 0 : index
    %c0_1 = arith.constant 0 : index
    %0 = vector.load %arg1[%c0, %c0_0, %c0_1] : memref<8x19x16xf32, #tpu.memory_space<vmem>>, vector<8x19x16xf32>
    %1 = vector.extract_strided_slice %0 {offsets = [0, 0, 0], sizes = [8, 15, 16], strides = [1, 1, 1]} : vector<8x19x16xf32> to vector<8x15x16xf32>
    %2 = vector.extract_strided_slice %0 {offsets = [0, 1, 0], sizes = [8, 15, 16], strides = [1, 1, 1]} : vector<8x19x16xf32> to vector<8x15x16xf32>
    %3 = vector.extract_strided_slice %0 {offsets = [0, 2, 0], sizes = [8, 15, 16], strides = [1, 1, 1]} : vector<8x19x16xf32> to vector<8x15x16xf32>
    %4 = vector.extract_strided_slice %0 {offsets = [0, 3, 0], sizes = [8, 15, 16], strides = [1, 1, 1]} : vector<8x19x16xf32> to vector<8x15x16xf32>
    %5 = vector.extract_strided_slice %0 {offsets = [0, 4, 0], sizes = [8, 15, 16], strides = [1, 1, 1]} : vector<8x19x16xf32> to vector<8x15x16xf32>
    %6 = tpu.concatenate %1, %2, %3, %4, %5 in 2 : vector<8x15x16xf32>, vector<8x15x16xf32>, vector<8x15x16xf32>, vector<8x15x16xf32>, vector<8x15x16xf32> -> vector<8x15x80xf32>
    %7 = vector.shape_cast %6 : vector<8x15x80xf32> to vector<120x80xf32>
    %c0_2 = arith.constant 0 : index
    %c0_3 = arith.constant 0 : index
    %8 = vector.load %arg2[%c0_2, %c0_3] : memref<80x128xf32, #tpu.memory_space<vmem>>, vector<80x128xf32>
    %cst = arith.constant dense<0.000000e+00> : vector<120x128xf32>
    %9 = tpu.matmul %7, %8, %cst {dimension_numbers = #tpu.dot_dimension_numbers<[1], [0], [0], [1], [0, 0, 1, 1], [], []>} : vector<120x80xf32>, vector<80x128xf32>, vector<120x128xf32> -> vector<120x128xf32>
    %c0_4 = arith.constant 0 : index
    %c0_5 = arith.constant 0 : index
    %10 = vector.load %arg3[%c0_4, %c0_5] : memref<1x128xf32, #tpu.memory_space<vmem>>, vector<1x128xf32>
    %11 = vector.broadcast %10 : vector<1x128xf32> to vector<120x128xf32>
    %12 = arith.addf %9, %11 : vector<120x128xf32>
    %cst_6 = arith.constant 0.000000e+00 : f32
    %13 = vector.broadcast %cst_6 : f32 to vector<120x128xf32>
    %14 = arith.maximumf %12, %13 : vector<120x128xf32>
    %15 = vector.shape_cast %14 : vector<120x128xf32> to vector<8x15x128xf32>
    %c0_7 = arith.constant 0 : index
    %c0_8 = arith.constant 0 : index
    %c0_9 = arith.constant 0 : index
    %16 = vector.load %arg4[%c0_7, %c0_8, %c0_9] : memref<1x15x128xf32, #tpu.memory_space<vmem>>, vector<1x15x128xf32>
    %17 = vector.broadcast %16 : vector<1x15x128xf32> to vector<8x15x128xf32>
    %18 = arith.mulf %15, %17 : vector<8x15x128xf32>
    %cst_10 = arith.constant dense<0xFF800000> : vector<8x128xf32>
    %19 = vector.multi_reduction <maximumf>, %18, %cst_10 [1] : vector<8x15x128xf32> to vector<8x128xf32>
    %c0_11 = arith.constant 0 : index
    %c0_12 = arith.constant 0 : index
    %20 = vector.load %arg5[%c0_11, %c0_12] : memref<128x128xf32, #tpu.memory_space<vmem>>, vector<128x128xf32>
    %cst_13 = arith.constant dense<0.000000e+00> : vector<8x128xf32>
    %21 = tpu.matmul %19, %20, %cst_13 {dimension_numbers = #tpu.dot_dimension_numbers<[1], [0], [0], [1], [0, 0, 1, 1], [], []>} : vector<8x128xf32>, vector<128x128xf32>, vector<8x128xf32> -> vector<8x128xf32>
    %c0_14 = arith.constant 0 : index
    %c0_15 = arith.constant 0 : index
    %22 = vector.load %arg6[%c0_14, %c0_15] : memref<1x128xf32, #tpu.memory_space<vmem>>, vector<1x128xf32>
    %23 = vector.broadcast %22 : vector<1x128xf32> to vector<8x128xf32>
    %24 = arith.addf %21, %23 : vector<8x128xf32>
    %cst_16 = arith.constant 0.000000e+00 : f32
    %25 = vector.broadcast %cst_16 : f32 to vector<8x128xf32>
    %26 = arith.maximumf %24, %25 : vector<8x128xf32>
    %c0_17 = arith.constant 0 : index
    %c0_18 = arith.constant 0 : index
    %27 = vector.load %arg7[%c0_17, %c0_18] : memref<1x128xf32, #tpu.memory_space<vmem>>, vector<1x128xf32>
    %28 = vector.broadcast %27 : vector<1x128xf32> to vector<8x128xf32>
    %29 = arith.mulf %26, %28 : vector<8x128xf32>
    %cst_19 = arith.constant dense<0.000000e+00> : vector<8xf32>
    %30 = vector.multi_reduction <add>, %29, %cst_19 [1] : vector<8x128xf32> to vector<8xf32>
    %31 = vector.shape_cast %30 : vector<8xf32> to vector<8x1xf32>
    %c0_20 = arith.constant 0 : index
    %c0_21 = arith.constant 0 : index
    %32 = vector.load %arg8[%c0_20, %c0_21] : memref<1x1xf32, #tpu.memory_space<vmem>>, vector<1x1xf32>
    %33 = vector.broadcast %32 : vector<1x1xf32> to vector<8x1xf32>
    %34 = arith.addf %31, %33 : vector<8x1xf32>
    %35 = vector.shape_cast %34 : vector<8x1xf32> to vector<8x1xf32>
    %36 = vector.broadcast %35 : vector<8x1xf32> to vector<8x128xf32>
    %c0_22 = arith.constant 0 : index
    %c0_23 = arith.constant 0 : index
    %37 = vector.load %arg9[%c0_22, %c0_23] : memref<8x128xf32, #tpu.memory_space<vmem>>, vector<8x128xf32>
    tpu.vector_store %arg9[%c0_22, %c0_23], %36 {strides = array<i32>} : memref<8x128xf32, #tpu.memory_space<vmem>>, vector<8x128xf32>,
    return
  }
  func.func @transform_0(%arg0: i32) -> (i32, i32, i32) {
    %c0_i32 = arith.constant 0 : i32
    %c0_i32_0 = arith.constant 0 : i32
    %c0_i32_1 = arith.constant 0 : i32
    return %arg0, %c0_i32, %c0_i32_0 : i32, i32, i32
  }
  func.func @transform_1(%arg0: i32) -> (i32, i32) {
    %c0_i32 = arith.constant 0 : i32
    %c0_i32_0 = arith.constant 0 : i32
    %c0_i32_1 = arith.constant 0 : i32
    return %c0_i32, %c0_i32_0 : i32, i32
  }
  func.func @transform_2(%arg0: i32) -> (i32, i32) {
    %c0_i32 = arith.constant 0 : i32
    %c0_i32_0 = arith.constant 0 : i32
    %c0_i32_1 = arith.constant 0 : i32
    return %c0_i32, %c0_i32_0 : i32, i32
  }
  func.func @transform_3(%arg0: i32) -> (i32, i32, i32) {
    %c0_i32 = arith.constant 0 : i32
    %c0_i32_0 = arith.constant 0 : i32
    %c0_i32_1 = arith.constant 0 : i32
    %c0_i32_2 = arith.constant 0 : i32
    return %c0_i32, %c0_i32_0, %c0_i32_1 : i32, i32, i32
  }
  func.func @transform_4(%arg0: i32) -> (i32, i32) {
    %c0_i32 = arith.constant 0 : i32
    %c0_i32_0 = arith.constant 0 : i32
    %c0_i32_1 = arith.constant 0 : i32
    return %c0_i32, %c0_i32_0 : i32, i32
  }
  func.func @transform_5(%arg0: i32) -> (i32, i32) {
    %c0_i32 = arith.constant 0 : i32
    %c0_i32_0 = arith.constant 0 : i32
    %c0_i32_1 = arith.constant 0 : i32
    return %c0_i32, %c0_i32_0 : i32, i32
  }
  func.func @transform_6(%arg0: i32) -> (i32, i32) {
    %c0_i32 = arith.constant 0 : i32
    %c0_i32_0 = arith.constant 0 : i32
    %c0_i32_1 = arith.constant 0 : i32
    return %c0_i32, %c0_i32_0 : i32, i32
  }
  func.func @transform_7(%arg0: i32) -> (i32, i32) {
    %c0_i32 = arith.constant 0 : i32
    %c0_i32_0 = arith.constant 0 : i32
    %c0_i32_1 = arith.constant 0 : i32
    return %c0_i32, %c0_i32_0 : i32, i32
  }
  func.func @transform_8(%arg0: i32) -> (i32, i32) {
    %c0_i32 = arith.constant 0 : i32
    %c0_i32_0 = arith.constant 0 : i32
    return %arg0, %c0_i32 : i32, i32
  }
}

</mosaic_0001>

<bundles_post_ra>
// kernel: tpu_custom_call.1
= control target key start
LH: loop header
LB: loop body
LE: loop exit
PB: predicated region body
PF: predicated region fallthrough
CT: control target
= control target key end

     0   :  { %s5962_s0 = inlined_call_operand.vmem [shape: f32[8,19,16], index: 0, kind: input, shape index: {}]   ;;  %s5963_s1 = inlined_call_operand.vmem [shape: f32[80,128], index: 1, kind: input, shape index: {}]   ;;  %s5964_s2 = inlined_call_operand.vmem [shape: f32[1,128], index: 2, kind: input, shape index: {}]   ;;  %s5965_s3 = inlined_call_operand.vmem [shape: f32[1,15,128], index: 3, kind: input, shape index: {}]   ;;  %s5966_s4 = inlined_call_operand.vmem [shape: f32[128,128], index: 4, kind: input, shape index: {}]   ;;  %s5967_s5 = inlined_call_operand.vmem [shape: f32[1,128], index: 5, kind: input, shape index: {}]   ;;  %s5968_s6 = inlined_call_operand.vmem [shape: f32[1,128], index: 6, kind: input, shape index: {}]   ;;  %s5969_s7 = inlined_call_operand.<no memory space> [shape: f32[1,1], index: 7, kind: input, shape index: {}]   ;;  %s5970_s8 = inlined_call_operand.hbm [shape: f32[8,128], index: 8, kind: output, shape index: {}]  }
   0x1   :  { %v13_v0 = vstv %s5969_s7 }
   0x2   :  { %14 = vst [vmem:[#allocation2] sm:$0x1] %v13_v0 }
   0x3   :  { %v4767_v1 = vld [vmem:[%s5962_s0] sm:$0xff]  ;;  %v4772_v2 = vld [vmem:[%s5962_s0 + $0x8] sm:$0xff]  ;;  %vm242_vm0 = vcmask 1044480   ;;  %vm72_vm1 = vcmask 1046528   ;;  %vm331_vm2 = vcmask 1043456   ;;  %vm153_vm3 = vcmask 1045504  }
   0x4   :  { %v243_v3 = vrot.slane %v4767_v1, 3  ;;  %v244_v4 = vrot.slane %v4772_v2, 3  ;;  %v73_v5 = vrot.slane %v4767_v1, 1  ;;  %v74_v6 = vrot.slane %v4772_v2, 1  ;;  %v34_v9 = vld [vmem:[%s5962_s0 + $0x10] sm:$0x7] }
   0x5   :  { %v332_v7 = vrot.slane %v4767_v1, 4  ;;  %v333_v8 = vrot.slane %v4772_v2, 4  ;;  %v154_v12 = vrot.slane %v4767_v1, 2  ;;  %v155_v13 = vrot.slane %v4772_v2, 2  ;;  %s4706_s12 = smov 48   ;;  %s4707_s13 = smov 16  }
   0x6   :  { %v245_v10 = vsel %vm242_vm0, %v243_v3, %v244_v4  ;;  %v75_v11 = vsel %vm72_vm1, %v73_v5, %v74_v6  ;;  %v157_v16 = vrot.slane %v34_v9, 2  ;;  %v4794_v17 = vld [vmem:[%s5962_s0 + $0x18] sm:$0xff]  ;;  %v4799_v18 = vld [vmem:[%s5962_s0 + $0x20] sm:$0xff]  ;;  %s4708_s18 = smov 64   ;;  %s4709_s19 = smov 32   ;;  %v246_v20 = vrot.slane %v34_v9, 3 }
   0x7   :  { %283 = vrot.lane.b32.xlu1 %v245_v10, %s4706_s12  ;;  %97 = vrot.lane.b32.xlu0 %v75_v11, %s4707_s13  ;;  %v334_v14 = vsel %vm331_vm2, %v332_v7, %v333_v8  ;;  %v156_v15 = vsel %vm153_vm3, %v154_v12, %v155_v13  ;;  %v76_v21 = vrot.slane %v4794_v17, 1  ;;  %v77_v22 = vrot.slane %v4799_v18, 1 }
   0x8   :  { %v158_v19 = vsel %vm153_vm3, %v155_v13, %v157_v16  ;;  %v335_v23 = vrot.slane %v34_v9, 4  ;;  %v247_v24 = vsel %vm242_vm0, %v244_v4, %v246_v20  ;;  %v159_v26 = vrot.slane %v4794_v17, 2 }
   0x9   :  { %v78_v25 = vsel %vm72_vm1, %v76_v21, %v77_v22  ;;  %v160_v27 = vrot.slane %v4799_v18, 2 }
   0xb   :  { %372 = vrot.lane.b32.xlu1 %v334_v14, %s4708_s18  ;;  %194 = vrot.lane.b32.xlu0 %v156_v15, %s4709_s19 }
   0xf   :  { %196 = vrot.lane.b32.xlu1 %v158_v19, %s4709_s19  ;;  %99 = vrot.lane.b32.xlu0 %v74_v6, %s4707_s13 }
  0x10   :  { %15 = vsyncpa [#allocation4], 0  ;;  %v336_v28 = vsel %vm331_vm2, %v333_v8, %v335_v23  ;;  %v337_v29 = vrot.slane %v4794_v17, 4  ;;  %v161_v30 = vsel %vm153_vm3, %v159_v26, %v160_v27  ;;  %v338_v31 = vrot.slane %v4799_v18, 4  ;;  %v37_v34 = vld [vmem:[%s5962_s0 + $0x28] sm:$0x7] }
  0x11   :  { %v248_v32 = vrot.slane %v4794_v17, 3  ;;  %v249_v33 = vrot.slane %v4799_v18, 3  ;;  %v162_v37 = vrot.slane %v37_v34, 2  ;;  %v4830_v38 = vld [vmem:[%s5962_s0 + $0x30] sm:$0xff]  ;;  %v4835_v39 = vld [vmem:[%s5962_s0 + $0x38] sm:$0xff]  ;;  %v251_v41 = vrot.slane %v37_v34, 3 }
  0x12   :  { %v339_v35 = vsel %vm331_vm2, %v337_v29, %v338_v31  ;;  %v79_v42 = vrot.slane %v4830_v38, 1  ;;  %v80_v43 = vrot.slane %v4835_v39, 1  ;;  %v340_v44 = vrot.slane %v37_v34, 4  ;;  %v40_v55 = vld [vmem:[%s5962_s0 + $0x40] sm:$0x7]  ;;  %v1281_v57 = vld [vmem:[%s5963_s1 + $0x8] sm:$0xff] }
  0x13   :  { %285 = vrot.lane.b32.xlu1 %v247_v24, %s4706_s12  ;;  %101 = vrot.lane.b32.xlu0 %v78_v25, %s4707_s13  ;;  %v250_v36 = vsel %vm242_vm0, %v248_v32, %v249_v33  ;;  %v163_v40 = vsel %vm153_vm3, %v160_v27, %v162_v37  ;;  %v252_v45 = vsel %vm242_vm0, %v249_v33, %v251_v41  ;;  %v164_v47 = vrot.slane %v4830_v38, 2  ;;  %v1280_v56 = vld [vmem:[%s5963_s1] sm:$0xff]  ;;  %v1282_v63 = vld [vmem:[%s5963_s1 + $0x10] sm:$0xff]  ;;  %s4715_s29 = smov [#allocation3]  }
  0x14   :  { %v81_v46 = vsel %vm72_vm1, %v79_v42, %v80_v43  ;;  %v165_v48 = vrot.slane %v4835_v39, 2  ;;  %v341_v49 = vsel %vm331_vm2, %v338_v31, %v340_v44  ;;  %v342_v50 = vrot.slane %v4830_v38, 4  ;;  %v1283_v0 = vld [vmem:[%s5963_s1 + $0x18] sm:$0xff]  ;;  %v4883_v6 = vld [vmem:[%s5962_s0 + $0x48] sm:$0xff]  ;;  %v4888_v7 = vld [vmem:[%s5962_s0 + $0x50] sm:$0xff]  ;;  %s4447_s30 = sshll.u32 %s4715_s29, 4  ;;  %s4448_s30 = int_to_ptr.vmem [resolvable:$true] %s4447_s30 }
  0x15   :  { %v343_v52 = vrot.slane %v4835_v39, 4  ;;  %v253_v53 = vrot.slane %v4830_v38, 3  ;;  %v254_v54 = vrot.slane %v4835_v39, 3  ;;  %v167_v60 = vrot.slane %v40_v55, 2  ;;  %v1284_v9 = vld [vmem:[%s5963_s1 + $0x20] sm:$0xff]  ;;  %v1285_v10 = vld [vmem:[%s5963_s1 + $0x28] sm:$0xff]  ;;  %p4687_p1 = scmp.lt.s32.totalorder %s4448_s30, %s4448_s30 }
  0x16   :  { %v166_v51 = vsel %vm153_vm3, %v164_v47, %v165_v48  ;;  %v4710_v61 = vmov 0.0|0.0   ;;  %v4629_v62 = vpack.c.bf16 %v1281_v57, %v1280_v56  ;;  %v345_v3 = vrot.slane %v40_v55, 4  ;;  %v1286_v21 = vld [vmem:[%s5963_s1 + $0x30] sm:$0xff]  ;;  %v1288_v31 = vld [vmem:[%s5963_s1 + $0x40] sm:$0xff]  ;;  %v1289_v32 = vld [vmem:[%s5963_s1 + $0x48] sm:$0xff] }
  0x17   :  { %374 = vrot.lane.b32.xlu1 %v336_v28, %s4708_s18  ;;  %198 = vrot.lane.b32.xlu0 %v161_v30, %s4709_s19  ;;  %v344_v58 = vsel %vm331_vm2, %v342_v50, %v343_v52  ;;  %v255_v59 = vsel %vm242_vm0, %v253_v53, %v254_v54  ;;  %v168_v4 = vsel %vm153_vm3, %v165_v48, %v167_v60  ;;  %v256_v5 = vrot.slane %v40_v55, 3  ;;  %v43_v30 = vld [vmem:[%s5962_s0 + $0x58] sm:$0x7]  ;;  %v4945_v42 = vld [vmem:[%s5962_s0 + $0x60] sm:$0xff] }
  0x18   :  { %4628 = vmatprep.subr.bf16.mxu0 %v4710_v61  ;;  %4643 = vmatprep.subr.bf16.mxu1 %v4710_v61  ;;  %v4632_v8 = vpack.c.bf16 %v1283_v0, %v1282_v63  ;;  %vm4711_vm4 = vmmov 0   ;;  %v4712_v11 = vmov 0.0   ;;  %v346_v12 = vsel %vm331_vm2, %v343_v52, %v345_v3  ;;  %v46_v56 = vld [vmem:[%s5962_s0 + $0x70] sm:$0x7]  ;;  %v4978_v60 = vld [vmem:[%s5962_s0 + $0x78] sm:$0xff] }
  0x19   :  { %4630 = vmatpush3.bf16.msra.mxu0 %v4629_v62  ;;  %4548 = vmatprep.mubr.msk.f32.mxu0 %vm4711_vm4, %v4712_v11  ;;  %v169_v13 = vrot.slane %v4883_v6, 2  ;;  %v170_v14 = vrot.slane %v4888_v7, 2  ;;  %v257_v15 = vsel %vm242_vm0, %v254_v54, %v256_v5  ;;  %v82_v16 = vrot.slane %v4883_v6, 1  ;;  %v4983_v62 = vld [vmem:[%s5962_s0 + $0x80] sm:$0xff] }
  0x1a   :  { %4631 = vmatprep.subr.bf16.mxu0 %v4710_v61  ;;  %4625 = vmatprep.mubr.msk.f32.mxu1 %vm4711_vm4, %v4712_v11  ;;  %v83_v19 = vrot.slane %v4888_v7, 1  ;;  %v4635_v20 = vpack.c.bf16 %v1285_v10, %v1284_v9  ;;  %v347_v24 = vrot.slane %v4883_v6, 4  ;;  %v348_v25 = vrot.slane %v4888_v7, 4 }
  0x1b   :  { %376 = vrot.lane.b32.xlu1 %v339_v35, %s4708_s18  ;;  %287 = vrot.lane.b32.xlu0 %v250_v36, %s4706_s12  ;;  %v171_v23 = vsel %vm153_vm3, %v169_v13, %v170_v14  ;;  %v258_v27 = vrot.slane %v4883_v6, 3  ;;  %v259_v28 = vrot.slane %v4888_v7, 3  ;;  %v172_v35 = vrot.slane %v43_v30, 2 }
  0x1c   :  { %v84_v26 = vsel %vm72_vm1, %v82_v16, %v83_v19  ;;  %v349_v33 = vsel %vm331_vm2, %v347_v24, %v348_v25  ;;  %v4641_v36 = vpack.c.bf16 %v1289_v32, %v1288_v31  ;;  %v261_v41 = vrot.slane %v43_v30, 3 }
  0x1d   :  { %4633 = vmatpush3.bf16.msra.mxu0 %v4632_v8  ;;  %v260_v34 = vsel %vm242_vm0, %v258_v27, %v259_v28  ;;  %v173_v37 = vsel %vm153_vm3, %v170_v14, %v172_v35  ;;  %v174_v44 = vrot.slane %v4945_v42, 2  ;;  %v85_v48 = vrot.slane %v4945_v42, 1 }
  0x1e   :  { %4634 = vmatprep.subr.bf16.mxu0 %v4710_v61  ;;  %v262_v47 = vsel %vm242_vm0, %v259_v28, %v261_v41  ;;  %v263_v54 = vrot.slane %v4945_v42, 3  ;;  %v266_v0 = vrot.slane %v46_v56, 3  ;;  %v88_v3 = vrot.slane %v4978_v60, 1  ;;  %v5017_v28 = vld [vmem:[%s5962_s0 + $0x90] sm:$0xff] }
  0x1f   :  { %200 = vrot.lane.b32.xlu1 %v163_v40, %s4709_s19  ;;  %103 = vrot.lane.b32.xlu0 %v77_v22, %s4707_s13  ;;  %v1287_v22 = vld [vmem:[%s5963_s1 + $0x38] sm:$0xff]  ;;  %v350_v40 = vrot.slane %v43_v30, 4  ;;  %v355_v5 = vrot.slane %v46_v56, 4  ;;  %v179_v10 = vrot.slane %v4978_v60, 2  ;;  %v268_v14 = vrot.slane %v4978_v60, 3 }
  0x20   :  { %v4638_v29 = vpack.c.bf16 %v1287_v22, %v1286_v21  ;;  %v269_v16 = vrot.slane %v4983_v62, 3  ;;  %v49_v21 = vld [vmem:[%s5962_s0 + $0x88] sm:$0x7]  ;;  %v91_v30 = vrot.slane %v5017_v28, 1  ;;  %vm420_vm5 = vcmask 130048  }
  0x21   :  { %4636 = vmatpush3.bf16.msra.mxu0 %v4635_v20  ;;  %v358_v20 = vrot.slane %v4983_v62, 4  ;;  %v182_v24 = vrot.slane %v49_v21, 2  ;;  %v360_v27 = vrot.slane %v49_v21, 4  ;;  %vm437_vm6 = vcmask 261120  }
  0x22   :  { %4637 = vmatprep.subr.bf16.mxu0 %v4710_v61  ;;  %v270_v22 = vsel %vm242_vm0, %v268_v14, %v269_v16  ;;  %v55_v14 = vld [vmem:[%s5962_s0 + $0xb8] sm:$0x7]  ;;  %vm454_vm7 = vcmask 392192   ;;  %vm471_vm8 = vcmask 523264   ;;  %vm2032_vm9 = vcmask 654336  }
  0x23   :  { %289 = vrot.lane.b32.xlu1 %v252_v45, %s4706_s12  ;;  %105 = vrot.lane.b32.xlu0 %v81_v46, %s4707_s13  ;;  %v351_v46 = vsel %vm331_vm2, %v348_v25, %v350_v40  ;;  %vm4331_vm10 = vcmask 1041409   ;;  %vm4333_vm11 = vcmask 1042434   ;;  %vm4335_vm12 = vcmask 1043459  }
  0x24   :  { %vm4337_vm13 = vcmask 1044484   ;;  %vm4339_vm14 = vcmask 1045509   ;;  %vm4341_vm15 = vcmask 1046534  }
  0x25   :  { %4639 = vmatpush3.bf16.msra.mxu0 %v4638_v29  ;;  %v5022_v29 = vld [vmem:[%s5962_s0 + $0x98] sm:$0xff] }
  0x26   :  { %4640 = vmatprep.subr.bf16.mxu0 %v4710_v61  ;;  %v92_v31 = vrot.slane %v5022_v29, 1  ;;  %v185_v35 = vrot.slane %v5022_v29, 2  ;;  %v274_v41 = vrot.slane %v5022_v29, 3 }
  0x27   :  { %378 = vrot.lane.b32.xlu1 %v341_v49, %s4708_s18  ;;  %202 = vrot.lane.b32.xlu0 %v166_v51, %s4709_s19  ;;  %v352_v51 = vrot.slane %v4945_v42, 4 }
  0x29   :  { %4642 = vmatpush3.bf16.msra.mxu0 %v4641_v36  ;;  %v93_v36 = vsel %vm72_vm1, %v91_v30, %v92_v31 }
  0x2b   :  { %380 = vrot.lane.b32.xlu1 %v344_v58, %s4708_s18  ;;  %291 = vrot.lane.b32.xlu0 %v255_v59, %s4706_s12  ;;  %v177_v59 = vrot.slane %v46_v56, 2 }
  0x2f   :  { %204 = vrot.lane.b32.xlu1 %v168_v4, %s4709_s19  ;;  %107 = vrot.lane.b32.xlu0 %v80_v43, %s4707_s13  ;;  %v4950_v43 = vld [vmem:[%s5962_s0 + $0x68] sm:$0xff]  ;;  %v89_v4 = vrot.slane %v4983_v62, 1 }
  0x30   :  { %v175_v45 = vrot.slane %v4950_v43, 2  ;;  %v86_v49 = vrot.slane %v4950_v43, 1  ;;  %v353_v53 = vrot.slane %v4950_v43, 4  ;;  %v264_v55 = vrot.slane %v4950_v43, 3 }
  0x31   :  { %v90_v9 = vsel %vm72_vm1, %v88_v3, %v89_v4 }
  0x32   :  { %v176_v50 = vsel %vm153_vm3, %v174_v44, %v175_v45  ;;  %v87_v52 = vsel %vm72_vm1, %v85_v48, %v86_v49  ;;  %v354_v57 = vsel %vm331_vm2, %v352_v51, %v353_v53  ;;  %v265_v58 = vsel %vm242_vm0, %v263_v54, %v264_v55  ;;  %v5058_v54 = vld [vmem:[%s5962_s0 + $0xb0] sm:$0xff] }
  0x33   :  { %382 = vrot.lane.b32.xlu1 %v346_v12, %s4708_s18  ;;  %293 = vrot.lane.b32.xlu0 %v257_v15, %s4706_s12  ;;  %v178_v63 = vsel %vm153_vm3, %v175_v45, %v177_v59  ;;  %v267_v8 = vsel %vm242_vm0, %v264_v55, %v266_v0  ;;  %v180_v12 = vrot.slane %v4983_v62, 2  ;;  %v356_v13 = vsel %vm331_vm2, %v353_v53, %v355_v5  ;;  %v5053_v53 = vld [vmem:[%s5962_s0 + $0xa8] sm:$0xff] }
  0x34   :  { %v362_v44 = vrot.slane %v5017_v28, 4  ;;  %v363_v45 = vrot.slane %v5022_v29, 4  ;;  %v94_v55 = vrot.slane %v5053_v53, 1  ;;  %v95_v56 = vrot.slane %v5058_v54, 1 }
  0x35   :  { %v181_v15 = vsel %vm153_vm3, %v179_v10, %v180_v12  ;;  %v183_v25 = vsel %vm153_vm3, %v180_v12, %v182_v24  ;;  %v189_v59 = vrot.slane %v5053_v53, 2  ;;  %v278_v3 = vrot.slane %v5053_v53, 3 }
  0x36   :  { %v364_v48 = vsel %vm331_vm2, %v362_v44, %v363_v45  ;;  %v96_v0 = vsel %vm72_vm1, %v94_v55, %v95_v56  ;;  %v279_v5 = vrot.slane %v5058_v54, 3  ;;  %v4713_v10 = vmov 1966171168  }
  0x37   :  { %206 = vrot.lane.b32.xlu1 %v171_v23, %s4709_s19  ;;  %109 = vrot.lane.b32.xlu0 %v84_v26, %s4707_s13  ;;  %v271_v26 = vrot.slane %v49_v21, 3  ;;  %v506_v12 = vunpack.c.l.s4 %v4713_v10 }
  0x39   :  { %v272_v32 = vsel %vm242_vm0, %v269_v16, %v271_v26  ;;  %v370_v26 = vrot.slane %v55_v14, 4 }
  0x3b   :  { %384 = vrot.lane.b32.xlu1 %v349_v33, %s4708_s18  ;;  %295 = vrot.lane.b32.xlu0 %v260_v34, %s4706_s12  ;;  %v361_v33 = vsel %vm331_vm2, %v358_v20, %v360_v27  ;;  %v184_v34 = vrot.slane %v5017_v28, 2 }
  0x3d   :  { %v186_v40 = vsel %vm153_vm3, %v184_v34, %v185_v35 }
  0x3f   :  { %208 = vrot.lane.b32.xlu1 %v173_v37, %s4709_s19  ;;  %111 = vrot.lane.b32.xlu0 %v83_v19, %s4707_s13  ;;  %v357_v19 = vrot.slane %v4978_v60, 4  ;;  %v273_v37 = vrot.slane %v5017_v28, 3 }
  0x41   :  { %v359_v23 = vsel %vm331_vm2, %v357_v19, %v358_v20  ;;  %v192_v19 = vrot.slane %v55_v14, 2 }
  0x43   :  { %386 = vrot.lane.b32.xlu1 %v351_v46, %s4708_s18  ;;  %297 = vrot.lane.b32.xlu0 %v262_v47, %s4706_s12  ;;  %v52_v46 = vld [vmem:[%s5962_s0 + $0xa0] sm:$0x7]  ;;  %v275_v47 = vsel %vm242_vm0, %v273_v37, %v274_v41 }
  0x44   :  { %v276_v51 = vrot.slane %v52_v46, 3 }
  0x47   :  { %210 = vrot.lane.b32.xlu1 %v176_v50, %s4709_s19  ;;  %113 = vrot.lane.b32.xlu0 %v87_v52, %s4707_s13  ;;  %v365_v52 = vrot.slane %v52_v46, 4 }
  0x4b   :  { %388 = vrot.lane.b32.xlu1 %v354_v57, %s4708_s18  ;;  %299 = vrot.lane.b32.xlu0 %v265_v58, %s4706_s12  ;;  %v277_v57 = vsel %vm242_vm0, %v274_v41, %v276_v51  ;;  %v366_v58 = vsel %vm331_vm2, %v363_v45, %v365_v52 }
  0x4f   :  { %212 = vrot.lane.b32.xlu1 %v178_v63, %s4709_s19  ;;  %115 = vrot.lane.b32.xlu0 %v86_v49, %s4707_s13  ;;  %v187_v49 = vrot.slane %v52_v46, 2  ;;  %v190_v63 = vrot.slane %v5058_v54, 2 }
  0x51   :  { %v188_v50 = vsel %vm153_vm3, %v185_v35, %v187_v49  ;;  %v193_v24 = vsel %vm153_vm3, %v190_v63, %v192_v19 }
  0x53   :  { %301 = vrot.lane.b32.xlu1 %v267_v8, %s4706_s12  ;;  %117 = vrot.lane.b32.xlu0 %v90_v9, %s4707_s13  ;;  %v367_v8 = vrot.slane %v5053_v53, 4  ;;  %v368_v9 = vrot.slane %v5058_v54, 4 }
  0x55   :  { %v369_v16 = vsel %vm331_vm2, %v367_v8, %v368_v9  ;;  %v371_v37 = vsel %vm331_vm2, %v368_v9, %v370_v26 }
  0x57   :  { %390 = vrot.lane.b32.xlu1 %v356_v13, %s4708_s18  ;;  %214 = vrot.lane.b32.xlu0 %v181_v15, %s4709_s19  ;;  %v508_v13 = vlaneseq  ;;  %v280_v15 = vsel %vm242_vm0, %v278_v3, %v279_v5 }
  0x5b   :  { %303 = vrot.lane.b32.xlu0 %v270_v22, %s4706_s12  ;;  %392 = vrot.lane.b32.xlu1 %v359_v23, %s4708_s18  ;;  %v507_v22 = vunpack.c.0.s8 %v506_v12  ;;  %v509_v23 = vshrl.u32 %v508_v13, 7 }
  0x5f   :  { %119 = vrot.lane.b32.xlu0 %v89_v4, %s4707_s13  ;;  %216 = vrot.lane.b32.xlu1 %v183_v25, %s4709_s19  ;;  %v191_v4 = vsel %vm153_vm3, %v189_v59, %v190_v63  ;;  %v281_v25 = vrot.slane %v55_v14, 3 }
  0x63   :  { %305 = vrot.lane.b32.xlu0 %v272_v32, %s4706_s12  ;;  %394 = vrot.lane.b32.xlu1 %v361_v33, %s4708_s18 }
  0x67   :  { %121 = vrot.lane.b32.xlu0 %v93_v36, %s4707_s13  ;;  %218 = vrot.lane.b32.xlu1 %v186_v40, %s4709_s19  ;;  %v282_v36 = vsel %vm242_vm0, %v279_v5, %v281_v25  ;;  %vm4343_vm0 = vcmask 1047559  }
  0x6b   :  { %307 = vrot.lane.b32.xlu0 %v275_v47, %s4706_s12  ;;  %396 = vrot.lane.b32.xlu1 %v364_v48, %s4708_s18 }
  0x6f   :  { %123 = vrot.lane.b32.xlu0 %v92_v31, %s4707_s13  ;;  %220 = vrot.lane.b32.xlu1 %v188_v50, %s4709_s19  ;;  %v5088_v31 = vsub.s32 %v507_v22, %v509_v23 }
  0x73   :  { %309 = vrot.lane.b32.xlu0 %v277_v57, %s4706_s12  ;;  %398 = vrot.lane.b32.xlu1 %v366_v58, %s4708_s18 }
  0x77   :  { %125 = vrot.lane.b32.xlu0 %v96_v0, %s4707_s13  ;;  %222 = vrot.lane.b32.xlu1 %v191_v4, %s4709_s19 }
  0x79   :  { %v284_v20 = vpop.permute.xlu1 %283  ;;  %v98_v21 = vpop.permute.xlu0 %97 }
  0x7a   :  { %v421_v27 = vsel %vm420_vm5, %v4767_v1, %v98_v21 }
  0x7b   :  { %311 = vrot.lane.b32.xlu0 %v280_v15, %s4706_s12  ;;  %400 = vrot.lane.b32.xlu1 %v369_v16, %s4708_s18 }
  0x7d   :  { %v373_v30 = vpop.permute.xlu1 %372  ;;  %v195_v32 = vpop.permute.xlu0 %194 }
  0x7e   :  { %v438_v33 = vsel %vm437_vm6, %v421_v27, %v195_v32 }
  0x7f   :  { %v455_v34 = vsel %vm454_vm7, %v438_v33, %v284_v20  ;;  %127 = vrot.lane.b32.xlu0 %v95_v56, %s4707_s13  ;;  %224 = vrot.lane.b32.xlu1 %v193_v24, %s4709_s19 }
  0x80   :  { %v472_v35 = vsel %vm471_vm8, %v455_v34, %v373_v30 }
  0x81   :  { %v504_v1 = vcombine.high %v472_v35, %v472_v35  ;;  %v511_v40 = vrot.slane %v472_v35, %v5088_v31  ;;  %v197_v41 = vpop.permute.xlu1 %196  ;;  %v100_v44 = vpop.permute.xlu0 %99 }
  0x82   :  { %v422_v47 = vsel %vm420_vm5, %v4772_v2, %v100_v44 }
  0x83   :  { %v518_v45 = vrot.slane %v504_v1, %v5088_v31  ;;  %v519_v46 = vcombine.high %v511_v40, %v511_v40  ;;  %313 = vrot.lane.b32.xlu0 %v282_v36, %s4706_s12  ;;  %402 = vrot.lane.b32.xlu1 %v371_v37, %s4708_s18  ;;  %v527_v49 = vrot.slane %v511_v40, %v5088_v31 }
  0x84   :  { %v439_v55 = vsel %vm437_vm6, %v422_v47, %v197_v41 }
  0x85   :  { %v520_v48 = vcombine.high %v518_v45, %v518_v45  ;;  %v541_v50 = vrot.slane %v519_v46, %v5088_v31  ;;  %v286_v51 = vpop.permute.xlu1 %285  ;;  %v102_v52 = vpop.permute.xlu0 %101  ;;  %v534_v56 = vrot.slane %v518_v45, %v5088_v31 }
  0x86   :  { %v456_v2 = vsel %vm454_vm7, %v439_v55, %v286_v51  ;;  %v423_v15 = vsel %vm420_vm5, %v4794_v17, %v102_v52 }
  0x87   :  { %v548_v57 = vrot.slane %v520_v48, %v5088_v31  ;;  %v1297_v58 = vcombine.low %v527_v49, %v541_v50  ;;  %v4456_v59 = vcombine.high %v527_v49, %v541_v50 }
  0x89   :  { %v1299_v63 = vcombine.low %v534_v56, %v548_v57  ;;  %v4457_v0 = vcombine.high %v534_v56, %v548_v57  ;;  %v1307_v3 = vrot.slane %v1297_v58, %v5088_v31  ;;  %v1314_v4 = vrot.slane %v4456_v59, %v5088_v31  ;;  %v375_v5 = vpop.permute.xlu1 %374  ;;  %v199_v8 = vpop.permute.xlu0 %198 }
  0x8a   :  { %v473_v9 = vsel %vm471_vm8, %v456_v2, %v375_v5  ;;  %v440_v21 = vsel %vm437_vm6, %v423_v15, %v199_v8 }
  0x8b   :  { %v553_v10 = vcombine.high %v473_v9, %v473_v9  ;;  %v560_v12 = vrot.slane %v473_v9, %v5088_v31  ;;  %v1321_v13 = vrot.slane %v1299_v63, %v5088_v31  ;;  %v1328_v14 = vrot.slane %v4457_v0, %v5088_v31 }
  0x8c   :  { %v1329_v16 = vcombine.low %v1307_v3, %v1314_v4 }
  0x8d   :  { %v567_v19 = vrot.slane %v553_v10, %v5088_v31  ;;  %v568_v20 = vcombine.high %v560_v12, %v560_v12  ;;  %v377_v22 = vpop.permute.xlu1 %376  ;;  %v288_v23 = vpop.permute.xlu0 %287  ;;  %v1330_v24 = vcombine.low %v1321_v13, %v1328_v14  ;;  %v576_v25 = vrot.slane %v560_v12, %v5088_v31 }
  0x8e   :  { %v457_v26 = vsel %vm454_vm7, %v440_v21, %v288_v23  ;;  %v1337_v35 = vrot.slane %v1329_v16, %v5088_v31 }
  0x8f   :  { %v569_v27 = vcombine.high %v567_v19, %v567_v19  ;;  %v583_v30 = vrot.slane %v567_v19, %v5088_v31  ;;  %v590_v32 = vrot.slane %v568_v20, %v5088_v31  ;;  %v474_v17 = vsel %vm471_vm8, %v457_v26, %v377_v22 }
  0x90   :  { %v601_v33 = vcombine.high %v474_v17, %v474_v17  ;;  %v608_v34 = vrot.slane %v474_v17, %v5088_v31  ;;  %v1344_v36 = vrot.slane %v1330_v24, %v5088_v31 }
  0x91   :  { %v597_v37 = vrot.slane %v569_v27, %v5088_v31  ;;  %v599_v1 = vcombine.high %v583_v30, %v583_v30  ;;  %v1346_v40 = vcombine.low %v576_v25, %v590_v32  ;;  %v4458_v41 = vcombine.high %v576_v25, %v590_v32  ;;  %v201_v44 = vpop.permute.xlu1 %200  ;;  %v104_v45 = vpop.permute.xlu0 %103 }
  0x92   :  { %v615_v46 = vrot.slane %v601_v33, %v5088_v31  ;;  %v616_v47 = vcombine.high %v608_v34, %v608_v34  ;;  %v624_v48 = vrot.slane %v608_v34, %v5088_v31  ;;  %v1345_v52 = vcombine.low %v1337_v35, %v1344_v36 }
  0x93   :  { %v1348_v49 = vcombine.low %v583_v30, %v597_v37  ;;  %v1356_v50 = vrot.slane %v1346_v40, %v5088_v31  ;;  %v1363_v51 = vrot.slane %v4458_v41, %v5088_v31  ;;  %v424_v2 = vsel %vm420_vm5, %v4799_v18, %v104_v45 }
  0x94   :  { %v617_v55 = vcombine.high %v615_v46, %v615_v46  ;;  %v631_v56 = vrot.slane %v615_v46, %v5088_v31  ;;  %v638_v57 = vrot.slane %v616_v47, %v5088_v31  ;;  %v1349_v59 = vcombine.low %v599_v1, %v624_v48  ;;  %4549 = vmatmul.mubr.msk.f32.vlgmr.msra.gmra.mrb[0].mxu0 %vm2032_vm9, %v1345_v52 }
  0x95   :  { %v1370_v58 = vrot.slane %v1348_v49, %v5088_v31  ;;  %v290_v63 = vpop.permute.xlu1 %289  ;;  %v106_v0 = vpop.permute.xlu0 %105  ;;  %4551 = vmatprep.mubr.msk.f32.mxu0 %vm4711_vm4, %v4712_v11  ;;  %v1378_v4 = vcombine.low %v1356_v50, %v1363_v51  ;;  %v646_v8 = vcombine.high %v624_v48, %v624_v48  ;;  %v441_v10 = vsel %vm437_vm6, %v424_v2, %v201_v44 }
  0x96   :  { %v648_v3 = vcombine.high %v638_v57, %v638_v57  ;;  %v1377_v5 = vrot.slane %v1349_v59, %v5088_v31  ;;  %v647_v9 = vcombine.high %v631_v56, %v631_v56  ;;  %v645_v12 = vrot.slane %v617_v55, %v5088_v31 }
  0x97   :  { %v458_v13 = vsel %vm454_vm7, %v441_v10, %v290_v63  ;;  %v425_v19 = vsel %vm420_vm5, %v4830_v38, %v106_v0  ;;  %v1386_v23 = vrot.slane %v1378_v4, %v5088_v31  ;;  %v1395_v25 = vcombine.low %v638_v57, %v646_v8 }
  0x98   :  { %v1379_v15 = vcombine.low %v1370_v58, %v1377_v5  ;;  %v1396_v16 = vcombine.low %v648_v3, %v631_v56  ;;  %v1397_v26 = vcombine.low %v645_v12, %v647_v9  ;;  %v649_v36 = vcombine.high %v645_v12, %v645_v12 }
  0x99   :  { %v379_v18 = vpop.permute.xlu1 %378  ;;  %v203_v14 = vpop.permute.xlu0 %202  ;;  %v1405_v45 = vrot.slane %v1395_v25, %v5088_v31 }
  0x9a   :  { %v475_v20 = vsel %vm471_vm8, %v458_v13, %v379_v18  ;;  %v1393_v24 = vrot.slane %v1379_v15, %v5088_v31  ;;  %v442_v27 = vsel %vm437_vm6, %v425_v19, %v203_v14  ;;  %v1412_v35 = vrot.slane %v1396_v16, %v5088_v31 }
  0x9b   :  { %v650_v21 = vcombine.high %v475_v20, %v475_v20  ;;  %v657_v22 = vrot.slane %v475_v20, %v5088_v31  ;;  %v1419_v47 = vrot.slane %v1397_v26, %v5088_v31 }
  0x9c   :  { %v1394_v34 = vcombine.low %v1386_v23, %v1393_v24  ;;  %v1427_v0 = vcombine.low %v1405_v45, %v1412_v35 }
  0x9d   :  { %v664_v30 = vrot.slane %v650_v21, %v5088_v31  ;;  %v665_v32 = vcombine.high %v657_v22, %v657_v22  ;;  %v673_v17 = vrot.slane %v657_v22, %v5088_v31  ;;  %v381_v33 = vpop.permute.xlu1 %380  ;;  %v292_v38 = vpop.permute.xlu0 %291 }
  0x9e   :  { %v459_v37 = vsel %vm454_vm7, %v442_v27, %v292_v38  ;;  %4552 = vmatmul.mubr.msk.f32.gmra.mrb[2].mxu0 %vm2032_vm9, %v1394_v34  ;;  %v1435_v21 = vrot.slane %v1427_v0, %v5088_v31 }
  0x9f   :  { %v666_v1 = vcombine.high %v664_v30, %v664_v30  ;;  %v680_v40 = vrot.slane %v664_v30, %v5088_v31  ;;  %v687_v41 = vrot.slane %v665_v32, %v5088_v31  ;;  %v695_v44 = vcombine.high %v673_v17, %v673_v17  ;;  %4554 = vmatprep.mubr.msk.f32.mxu0 %vm4711_vm4, %v4712_v11 }
  0xa0   :  { %v1398_v46 = vcombine.low %v649_v36, %v673_v17  ;;  %v476_v48 = vsel %vm471_vm8, %v459_v37, %v381_v33 }
  0xa1   :  { %v694_v49 = vrot.slane %v666_v1, %v5088_v31  ;;  %v696_v50 = vcombine.high %v680_v40, %v680_v40  ;;  %v697_v51 = vcombine.high %v687_v41, %v687_v41  ;;  %v1444_v52 = vcombine.low %v687_v41, %v695_v44  ;;  %v205_v55 = vpop.permute.xlu1 %204  ;;  %v108_v56 = vpop.permute.xlu0 %107 }
  0xa2   :  { %v1426_v57 = vrot.slane %v1398_v46, %v5088_v31  ;;  %v698_v58 = vcombine.high %v476_v48, %v476_v48  ;;  %v705_v59 = vrot.slane %v476_v48, %v5088_v31  ;;  %v426_v2 = vsel %vm420_vm5, %v4835_v39, %v108_v56 }
  0xa3   :  { %v1445_v63 = vcombine.low %v697_v51, %v680_v40  ;;  %v1446_v8 = vcombine.low %v694_v49, %v696_v50  ;;  %v1454_v9 = vrot.slane %v1444_v52, %v5088_v31  ;;  %v443_v13 = vsel %vm437_vm6, %v426_v2, %v205_v55 }
  0xa4   :  { %v1428_v3 = vcombine.low %v1419_v47, %v1426_v57  ;;  %v712_v4 = vrot.slane %v698_v58, %v5088_v31  ;;  %v713_v5 = vcombine.high %v705_v59, %v705_v59  ;;  %v721_v15 = vrot.slane %v705_v59, %v5088_v31 }
  0xa5   :  { %v1461_v10 = vrot.slane %v1445_v63, %v5088_v31  ;;  %v383_v12 = vpop.permute.xlu1 %382  ;;  %v294_v18 = vpop.permute.xlu0 %293  ;;  %v1468_v33 = vrot.slane %v1446_v8, %v5088_v31 }
  0xa6   :  { %v714_v14 = vcombine.high %v712_v4, %v712_v4  ;;  %v735_v39 = vrot.slane %v713_v5, %v5088_v31  ;;  %v460_v16 = vsel %vm454_vm7, %v443_v13, %v294_v18  ;;  %v728_v19 = vrot.slane %v712_v4, %v5088_v31 }
  0xa7   :  { %v477_v20 = vsel %vm471_vm8, %v460_v16, %v383_v12  ;;  %v1442_v22 = vrot.slane %v1428_v3, %v5088_v31  ;;  %v1476_v26 = vcombine.low %v1454_v9, %v1461_v10 }
  0xa8   :  { %v742_v23 = vrot.slane %v714_v14, %v5088_v31  ;;  %v1447_v24 = vcombine.low %v721_v15, %v735_v39  ;;  %v747_v25 = vcombine.high %v477_v20, %v477_v20  ;;  %v754_v27 = vrot.slane %v477_v20, %v5088_v31 }
  0xa9   :  { %v207_v30 = vpop.permute.xlu1 %206  ;;  %v1443_v32 = vcombine.low %v1435_v21, %v1442_v22  ;;  %v110_v17 = vpop.permute.xlu0 %109  ;;  %v4459_v34 = vcombine.high %v721_v15, %v735_v39  ;;  %v1484_v45 = vrot.slane %v1476_v26, %v5088_v31 }
  0xaa   :  { %v1475_v38 = vrot.slane %v1447_v24, %v5088_v31  ;;  %v1494_v35 = vcombine.low %v728_v19, %v742_v23  ;;  %v761_v36 = vrot.slane %v747_v25, %v5088_v31  ;;  %v762_v37 = vcombine.high %v754_v27, %v754_v27 }
  0xab   :  { %4555 = vmatmul.mubr.msk.f32.gmra.mrb[4].mxu0 %vm2032_vm9, %v1443_v32  ;;  %v427_v1 = vsel %vm420_vm5, %v4883_v6, %v110_v17  ;;  %v4460_v40 = vcombine.high %v728_v19, %v742_v23  ;;  %v770_v47 = vrot.slane %v754_v27, %v5088_v31  ;;  %v1503_v6 = vrot.slane %v4459_v34, %v5088_v31 }
  0xac   :  { %v1510_v41 = vrot.slane %v1494_v35, %v5088_v31  ;;  %4557 = vmatprep.mubr.msk.f32.mxu0 %vm4711_vm4, %v4712_v11  ;;  %v1477_v44 = vcombine.low %v1468_v33, %v1475_v38  ;;  %v763_v46 = vcombine.high %v761_v36, %v761_v36  ;;  %v784_v48 = vrot.slane %v762_v37, %v5088_v31 }
  0xad   :  { %v385_v49 = vpop.permute.xlu1 %384  ;;  %v444_v50 = vsel %vm437_vm6, %v427_v1, %v207_v30  ;;  %v296_v51 = vpop.permute.xlu0 %295  ;;  %v777_v52 = vrot.slane %v761_v36, %v5088_v31  ;;  %v1517_v3 = vrot.slane %v4460_v40, %v5088_v31 }
  0xae   :  { %v461_v55 = vsel %vm454_vm7, %v444_v50, %v296_v51  ;;  %v1491_v56 = vrot.slane %v1477_v44, %v5088_v31  ;;  %v791_v57 = vrot.slane %v763_v46, %v5088_v31  ;;  %v1496_v58 = vcombine.low %v770_v47, %v784_v48 }
  0xaf   :  { %v4461_v59 = vcombine.high %v770_v47, %v784_v48  ;;  %v478_v2 = vsel %vm471_vm8, %v461_v55, %v385_v49  ;;  %v1525_v0 = vcombine.low %v1503_v6, %v1510_v41  ;;  %v793_v12 = vcombine.high %v777_v52, %v777_v52 }
  0xb0   :  { %v1492_v63 = vcombine.low %v1484_v45, %v1491_v56  ;;  %v1524_v4 = vrot.slane %v1496_v58, %v5088_v31  ;;  %v1543_v5 = vcombine.low %v777_v52, %v791_v57  ;;  %v795_v8 = vcombine.high %v478_v2, %v478_v2 }
  0xb1   :  { %v209_v9 = vpop.permute.xlu1 %208  ;;  %v112_v10 = vpop.permute.xlu0 %111  ;;  %v802_v13 = vrot.slane %v478_v2, %v5088_v31  ;;  %v1552_v14 = vrot.slane %v4461_v59, %v5088_v31  ;;  %v1533_v22 = vrot.slane %v1525_v0, %v5088_v31 }
  0xb2   :  { %4558 = vmatmul.mubr.msk.f32.gmra.mrb[6].mxu0 %vm2032_vm9, %v1492_v63  ;;  %v428_v18 = vsel %vm420_vm5, %v4888_v7, %v112_v10  ;;  %v1559_v15 = vrot.slane %v1543_v5, %v5088_v31  ;;  %v809_v39 = vrot.slane %v795_v8, %v5088_v31  ;;  %v1526_v16 = vcombine.low %v1517_v3, %v1524_v4 }
  0xb3   :  { %4560 = vmatprep.mubr.msk.f32.mxu0 %vm4711_vm4, %v4712_v11  ;;  %v810_v19 = vcombine.high %v802_v13, %v802_v13  ;;  %v818_v20 = vrot.slane %v802_v13, %v5088_v31  ;;  %v445_v21 = vsel %vm437_vm6, %v428_v18, %v209_v9 }
  0xb4   :  { %v811_v23 = vcombine.high %v809_v39, %v809_v39  ;;  %v825_v7 = vrot.slane %v809_v39, %v5088_v31  ;;  %v1540_v26 = vrot.slane %v1526_v16, %v5088_v31  ;;  %v1574_v27 = vcombine.low %v1552_v14, %v1559_v15 }
  0xb5   :  { %v387_v24 = vpop.permute.xlu1 %386  ;;  %v298_v25 = vpop.permute.xlu0 %297  ;;  %v832_v30 = vrot.slane %v810_v19, %v5088_v31  ;;  %v840_v32 = vcombine.high %v818_v20, %v818_v20  ;;  %v1544_v17 = vcombine.low %v793_v12, %v818_v20 }
  0xb6   :  { %v462_v33 = vsel %vm454_vm7, %v445_v21, %v298_v25  ;;  %v839_v38 = vrot.slane %v811_v23, %v5088_v31  ;;  %v841_v34 = vcombine.high %v825_v7, %v825_v7  ;;  %v1541_v36 = vcombine.low %v1533_v22, %v1540_v26 }
  0xb7   :  { %v479_v35 = vsel %vm471_vm8, %v462_v33, %v387_v24  ;;  %v842_v37 = vcombine.high %v832_v30, %v832_v30  ;;  %v1545_v1 = vcombine.low %v832_v30, %v840_v32  ;;  %v1566_v41 = vrot.slane %v1544_v17, %v5088_v31 }
  0xb8   :  { %v844_v40 = vcombine.high %v479_v35, %v479_v35  ;;  %v1592_v44 = vcombine.low %v839_v38, %v841_v34  ;;  %v843_v45 = vcombine.high %v839_v38, %v839_v38  ;;  %v851_v46 = vrot.slane %v479_v35, %v5088_v31  ;;  %4561 = vmatmul.mubr.msk.f32.gmra.mrb[8].mxu0 %vm2032_vm9, %v1541_v36 }
  0xb9   :  { %v211_v47 = vpop.permute.xlu1 %210  ;;  %v114_v48 = vpop.permute.xlu0 %113  ;;  %v1573_v49 = vrot.slane %v1545_v1, %v5088_v31  ;;  %v1591_v50 = vcombine.low %v842_v37, %v825_v7  ;;  %4563 = vmatprep.mubr.msk.f32.mxu0 %vm4711_vm4, %v4712_v11  ;;  %v1582_v57 = vrot.slane %v1574_v27, %v5088_v31 }
  0xba   :  { %v858_v51 = vrot.slane %v844_v40, %v5088_v31  ;;  %v429_v6 = vsel %vm420_vm5, %v4945_v42, %v114_v48  ;;  %v859_v52 = vcombine.high %v851_v46, %v851_v46  ;;  %v867_v55 = vrot.slane %v851_v46, %v5088_v31 }
  0xbb   :  { %v446_v56 = vsel %vm437_vm6, %v429_v6, %v211_v47  ;;  %v1575_v2 = vcombine.low %v1566_v41, %v1573_v49  ;;  %v1608_v63 = vrot.slane %v1592_v44, %v5088_v31  ;;  %v1601_v0 = vrot.slane %v1591_v50, %v5088_v31 }
  0xbc   :  { %v860_v58 = vcombine.high %v858_v51, %v858_v51  ;;  %v874_v59 = vrot.slane %v858_v51, %v5088_v31  ;;  %v881_v42 = vrot.slane %v859_v52, %v5088_v31  ;;  %v889_v3 = vcombine.high %v867_v55, %v867_v55 }
  0xbd   :  { %v1593_v4 = vcombine.low %v843_v45, %v867_v55  ;;  %v389_v5 = vpop.permute.xlu1 %388  ;;  %v300_v8 = vpop.permute.xlu0 %299  ;;  %v1589_v13 = vrot.slane %v1575_v2, %v5088_v31  ;;  %v1623_v25 = vcombine.low %v1601_v0, %v1608_v63 }
  0xbe   :  { %v888_v9 = vrot.slane %v860_v58, %v5088_v31  ;;  %v890_v10 = vcombine.high %v874_v59, %v874_v59  ;;  %v463_v12 = vsel %vm454_vm7, %v446_v56, %v300_v8  ;;  %v891_v18 = vcombine.high %v881_v42, %v881_v42 }
  0xbf   :  { %v1594_v14 = vcombine.low %v881_v42, %v889_v3  ;;  %v480_v15 = vsel %vm471_vm8, %v463_v12, %v389_v5  ;;  %v1590_v20 = vcombine.low %v1582_v57, %v1589_v13  ;;  %v1615_v21 = vrot.slane %v1593_v4, %v5088_v31 }
  0xc0   :  { %v1641_v39 = vcombine.low %v888_v9, %v890_v10  ;;  %v892_v16 = vcombine.high %v480_v15, %v480_v15  ;;  %v899_v19 = vrot.slane %v480_v15, %v5088_v31  ;;  %v1640_v23 = vcombine.low %v891_v18, %v874_v59 }
  0xc1   :  { %v1622_v22 = vrot.slane %v1594_v14, %v5088_v31  ;;  %v213_v7 = vpop.permute.xlu1 %212  ;;  %v116_v24 = vpop.permute.xlu0 %115  ;;  %4564 = vmatmul.mubr.msk.f32.gmra.mrb[10].mxu0 %vm2032_vm9, %v1590_v20  ;;  %v1631_v1 = vrot.slane %v1623_v25, %v5088_v31 }
  0xc2   :  { %v906_v26 = vrot.slane %v892_v16, %v5088_v31  ;;  %v907_v27 = vcombine.high %v899_v19, %v899_v19  ;;  %v915_v30 = vrot.slane %v899_v19, %v5088_v31  ;;  %v430_v32 = vsel %vm420_vm5, %v4950_v43, %v116_v24  ;;  %4566 = vmatprep.mubr.msk.f32.mxu0 %vm4711_vm4, %v4712_v11 }
  0xc3   :  { %v1624_v17 = vcombine.low %v1615_v21, %v1622_v22  ;;  %v1650_v33 = vrot.slane %v1640_v23, %v5088_v31  ;;  %v1657_v35 = vrot.slane %v1641_v39, %v5088_v31  ;;  %v447_v45 = vsel %vm437_vm6, %v430_v32, %v213_v7 }
  0xc4   :  { %v908_v38 = vcombine.high %v906_v26, %v906_v26  ;;  %v929_v34 = vrot.slane %v907_v27, %v5088_v31  ;;  %v922_v47 = vrot.slane %v906_v26, %v5088_v31 }
  0xc5   :  { %v302_v36 = vpop.permute.xlu1 %301  ;;  %v118_v37 = vpop.permute.xlu0 %117  ;;  %v1638_v40 = vrot.slane %v1624_v17, %v5088_v31  ;;  %v1672_v50 = vcombine.low %v1650_v33, %v1657_v35 }
  0xc6   :  { %v936_v41 = vrot.slane %v908_v38, %v5088_v31  ;;  %v1642_v43 = vcombine.low %v915_v30, %v929_v34  ;;  %v4462_v44 = vcombine.high %v915_v30, %v929_v34  ;;  %v464_v51 = vsel %vm454_vm7, %v447_v45, %v302_v36 }
  0xc7   :  { %v1639_v46 = vcombine.low %v1631_v1, %v1638_v40  ;;  %v431_v63 = vsel %vm420_vm5, %v4978_v60, %v118_v37  ;;  %v1680_v0 = vrot.slane %v1672_v50, %v5088_v31 }
  0xc8   :  { %v1664_v48 = vrot.slane %v1642_v43, %v5088_v31  ;;  %v1671_v49 = vrot.slane %v4462_v44, %v5088_v31  ;;  %v1689_v55 = vcombine.low %v922_v47, %v936_v41  ;;  %v4463_v56 = vcombine.high %v922_v47, %v936_v41 }
  0xc9   :  { %4567 = vmatmul.mubr.msk.f32.gmra.mrb[12].mxu0 %vm2032_vm9, %v1639_v46  ;;  %v391_v6 = vpop.permute.xlu1 %390  ;;  %v215_v52 = vpop.permute.xlu0 %214 }
  0xca   :  { %v481_v57 = vsel %vm471_vm8, %v464_v51, %v391_v6  ;;  %4569 = vmatprep.mubr.msk.f32.mxu0 %vm4711_vm4, %v4712_v11  ;;  %v1673_v2 = vcombine.low %v1664_v48, %v1671_v49  ;;  %v448_v4 = vsel %vm437_vm6, %v431_v63, %v215_v52  ;;  %v1699_v10 = vrot.slane %v1689_v55, %v5088_v31 }
  0xcb   :  { %v941_v58 = vcombine.high %v481_v57, %v481_v57  ;;  %v948_v59 = vrot.slane %v481_v57, %v5088_v31  ;;  %v1706_v12 = vrot.slane %v4463_v56, %v5088_v31 }
  0xcc   :  { %v1687_v9 = vrot.slane %v1673_v2, %v5088_v31 }
  0xcd   :  { %v955_v42 = vrot.slane %v941_v58, %v5088_v31  ;;  %v956_v3 = vcombine.high %v948_v59, %v948_v59  ;;  %v304_v5 = vpop.permute.xlu0 %303  ;;  %v393_v8 = vpop.permute.xlu1 %392  ;;  %v964_v13 = vrot.slane %v948_v59, %v5088_v31  ;;  %v1721_v32 = vcombine.low %v1699_v10, %v1706_v12 }
  0xce   :  { %v465_v18 = vsel %vm454_vm7, %v448_v4, %v304_v5  ;;  %v1688_v20 = vcombine.low %v1680_v0, %v1687_v9 }
  0xcf   :  { %v957_v60 = vcombine.high %v955_v42, %v955_v42  ;;  %v971_v14 = vrot.slane %v955_v42, %v5088_v31  ;;  %v978_v15 = vrot.slane %v956_v3, %v5088_v31  ;;  %v482_v39 = vsel %vm471_vm8, %v465_v18, %v393_v8 }
  0xd0   :  { %v989_v16 = vcombine.high %v482_v39, %v482_v39  ;;  %v996_v19 = vrot.slane %v482_v39, %v5088_v31  ;;  %4570 = vmatmul.mubr.msk.f32.gmra.mrb[14].mxu0 %vm2032_vm9, %v1688_v20  ;;  %v1729_v50 = vrot.slane %v1721_v32, %v5088_v31 }
  0xd1   :  { %v985_v21 = vrot.slane %v957_v60, %v5088_v31  ;;  %v1691_v22 = vcombine.low %v964_v13, %v978_v15  ;;  %v4464_v23 = vcombine.high %v964_v13, %v978_v15  ;;  %v987_v7 = vcombine.high %v971_v14, %v971_v14  ;;  %v120_v24 = vpop.permute.xlu0 %119  ;;  %v217_v25 = vpop.permute.xlu1 %216  ;;  %4572 = vmatprep.mubr.msk.f32.mxu0 %vm4711_vm4, %v4712_v11 }
  0xd2   :  { %v1003_v26 = vrot.slane %v989_v16, %v5088_v31  ;;  %v1004_v27 = vcombine.high %v996_v19, %v996_v19  ;;  %v1012_v30 = vrot.slane %v996_v19, %v5088_v31  ;;  %v432_v34 = vsel %vm420_vm5, %v4983_v62, %v120_v24 }
  0xd3   :  { %v1713_v17 = vrot.slane %v1691_v22, %v5088_v31  ;;  %v1720_v33 = vrot.slane %v4464_v23, %v5088_v31  ;;  %v1738_v38 = vcombine.low %v971_v14, %v985_v21  ;;  %v449_v48 = vsel %vm437_vm6, %v432_v34, %v217_v25 }
  0xd4   :  { %v1005_v35 = vcombine.high %v1003_v26, %v1003_v26  ;;  %v1019_v36 = vrot.slane %v1003_v26, %v5088_v31  ;;  %v1026_v37 = vrot.slane %v1004_v27, %v5088_v31  ;;  %v1034_v1 = vcombine.high %v1012_v30, %v1012_v30 }
  0xd5   :  { %v1722_v40 = vcombine.low %v1713_v17, %v1720_v33  ;;  %v1739_v41 = vcombine.low %v987_v7, %v1012_v30  ;;  %v306_v43 = vpop.permute.xlu0 %305  ;;  %v395_v44 = vpop.permute.xlu1 %394  ;;  %v1748_v45 = vrot.slane %v1738_v38, %v5088_v31 }
  0xd6   :  { %v1036_v46 = vcombine.high %v1026_v37, %v1026_v37  ;;  %v1740_v47 = vcombine.low %v1026_v37, %v1034_v1  ;;  %v466_v49 = vsel %vm454_vm7, %v449_v48, %v306_v43  ;;  %v1033_v6 = vrot.slane %v1005_v35, %v5088_v31 }
  0xd7   :  { %v1755_v62 = vrot.slane %v1739_v41, %v5088_v31  ;;  %v1736_v51 = vrot.slane %v1722_v40, %v5088_v31  ;;  %v1035_v52 = vcombine.high %v1019_v36, %v1019_v36  ;;  %v483_v56 = vsel %vm471_vm8, %v466_v49, %v395_v44 }
  0xd8   :  { %v1741_v55 = vcombine.low %v1036_v46, %v1019_v36  ;;  %v1762_v57 = vrot.slane %v1740_v47, %v5088_v31  ;;  %v1038_v58 = vcombine.high %v483_v56, %v483_v56  ;;  %v1045_v59 = vrot.slane %v483_v56, %v5088_v31 }
  0xd9   :  { %v122_v2 = vpop.permute.xlu0 %121  ;;  %v219_v63 = vpop.permute.xlu1 %218  ;;  %v1770_v42 = vcombine.low %v1748_v45, %v1755_v62  ;;  %v1737_v4 = vcombine.low %v1729_v50, %v1736_v51  ;;  %v1787_v10 = vcombine.low %v1033_v6, %v1035_v52  ;;  %v1037_v12 = vcombine.high %v1033_v6, %v1033_v6 }
  0xda   :  { %v1769_v0 = vrot.slane %v1741_v55, %v5088_v31  ;;  %v433_v3 = vsel %vm420_vm5, %v5017_v28, %v122_v2  ;;  %v1052_v5 = vrot.slane %v1038_v58, %v5088_v31  ;;  %v1053_v8 = vcombine.high %v1045_v59, %v1045_v59 }
  0xdb   :  { %v1061_v9 = vrot.slane %v1045_v59, %v5088_v31  ;;  %v450_v13 = vsel %vm437_vm6, %v433_v3, %v219_v63  ;;  %4573 = vmatmul.mubr.msk.f32.gmra.mrb[16].mxu0 %vm2032_vm9, %v1737_v4  ;;  %v1778_v21 = vrot.slane %v1770_v42, %v5088_v31  ;;  %v1797_v24 = vrot.slane %v1787_v10, %v5088_v31 }
  0xdc   :  { %v1771_v18 = vcombine.low %v1762_v57, %v1769_v0  ;;  %v1054_v60 = vcombine.high %v1052_v5, %v1052_v5  ;;  %v1068_v14 = vrot.slane %v1052_v5, %v5088_v31  ;;  %v1075_v15 = vrot.slane %v1053_v8, %v5088_v31  ;;  %4575 = vmatprep.mubr.msk.f32.mxu0 %vm4711_vm4, %v4712_v11 }
  0xdd   :  { %v1083_v39 = vcombine.high %v1061_v9, %v1061_v9  ;;  %v308_v28 = vpop.permute.xlu0 %307  ;;  %v397_v16 = vpop.permute.xlu1 %396  ;;  %v1788_v19 = vcombine.low %v1037_v12, %v1061_v9 }
  0xde   :  { %v467_v20 = vsel %vm454_vm7, %v450_v13, %v308_v28  ;;  %v1785_v22 = vrot.slane %v1771_v18, %v5088_v31  ;;  %v1085_v23 = vcombine.high %v1075_v15, %v1075_v15  ;;  %v1082_v30 = vrot.slane %v1054_v60, %v5088_v31 }
  0xdf   :  { %v1789_v7 = vcombine.low %v1075_v15, %v1083_v39  ;;  %v1804_v25 = vrot.slane %v1788_v19, %v5088_v31  ;;  %v484_v26 = vsel %vm471_vm8, %v467_v20, %v397_v16  ;;  %v1084_v32 = vcombine.high %v1068_v14, %v1068_v14 }
  0xe0   :  { %v1786_v27 = vcombine.low %v1778_v21, %v1785_v22  ;;  %v1790_v17 = vcombine.low %v1085_v23, %v1068_v14  ;;  %v1086_v33 = vcombine.high %v484_v26, %v484_v26  ;;  %v1093_v36 = vrot.slane %v484_v26, %v5088_v31 }
  0xe1   :  { %v124_v38 = vpop.permute.xlu0 %123  ;;  %v221_v34 = vpop.permute.xlu1 %220  ;;  %v1819_v35 = vcombine.low %v1797_v24, %v1804_v25  ;;  %v1811_v1 = vrot.slane %v1789_v7, %v5088_v31  ;;  %v1836_v44 = vcombine.low %v1082_v30, %v1084_v32 }
  0xe2   :  { %v434_v37 = vsel %vm420_vm5, %v5022_v29, %v124_v38  ;;  %4576 = vmatmul.mubr.msk.f32.gmra.mrb[18].mxu0 %vm2032_vm9, %v1786_v27  ;;  %v1818_v40 = vrot.slane %v1790_v17, %v5088_v31  ;;  %v1100_v41 = vrot.slane %v1086_v33, %v5088_v31  ;;  %v1101_v43 = vcombine.high %v1093_v36, %v1093_v36 }
  0xe3   :  { %4578 = vmatprep.mubr.msk.f32.mxu0 %vm4711_vm4, %v4712_v11  ;;  %v451_v46 = vsel %vm437_vm6, %v434_v37, %v221_v34  ;;  %v1109_v29 = vrot.slane %v1093_v36, %v5088_v31  ;;  %v1827_v51 = vrot.slane %v1819_v35, %v5088_v31  ;;  %v1846_v4 = vrot.slane %v1836_v44, %v5088_v31 }
  0xe4   :  { %v1102_v45 = vcombine.high %v1100_v41, %v1100_v41  ;;  %v1820_v62 = vcombine.low %v1811_v1, %v1818_v40  ;;  %v1123_v49 = vrot.slane %v1101_v43, %v5088_v31  ;;  %v1116_v6 = vrot.slane %v1100_v41, %v5088_v31 }
  0xe5   :  { %v310_v47 = vpop.permute.xlu0 %309  ;;  %v399_v48 = vpop.permute.xlu1 %398 }
  0xe6   :  { %v468_v50 = vsel %vm454_vm7, %v451_v46, %v310_v47  ;;  %v1130_v52 = vrot.slane %v1102_v45, %v5088_v31  ;;  %v1834_v56 = vrot.slane %v1820_v62, %v5088_v31  ;;  %v1837_v57 = vcombine.low %v1109_v29, %v1123_v49 }
  0xe7   :  { %v485_v55 = vsel %vm471_vm8, %v468_v50, %v399_v48  ;;  %v4465_v58 = vcombine.high %v1109_v29, %v1123_v49 }
  0xe8   :  { %v1135_v59 = vcombine.high %v485_v55, %v485_v55  ;;  %v1142_v2 = vrot.slane %v485_v55, %v5088_v31  ;;  %v1839_v63 = vcombine.low %v1116_v6, %v1130_v52  ;;  %v1835_v3 = vcombine.low %v1827_v51, %v1834_v56 }
  0xe9   :  { %v126_v0 = vpop.permute.xlu0 %125  ;;  %v223_v42 = vpop.permute.xlu1 %222  ;;  %v1853_v5 = vrot.slane %v1837_v57, %v5088_v31  ;;  %v1860_v10 = vrot.slane %v4465_v58, %v5088_v31  ;;  %v4466_v28 = vcombine.high %v1116_v6, %v1130_v52 }
  0xea   :  { %v1149_v8 = vrot.slane %v1135_v59, %v5088_v31  ;;  %v1150_v9 = vcombine.high %v1142_v2, %v1142_v2  ;;  %v1867_v12 = vrot.slane %v1839_v63, %v5088_v31  ;;  %v435_v13 = vsel %vm420_vm5, %v5053_v53, %v126_v0  ;;  %4579 = vmatmul.mubr.msk.f32.gmra.mrb[20].mxu0 %vm2032_vm9, %v1835_v3 }
  0xeb   :  { %v1868_v18 = vcombine.low %v1846_v4, %v1853_v5  ;;  %v1158_v14 = vrot.slane %v1142_v2, %v5088_v31  ;;  %4581 = vmatprep.mubr.msk.f32.mxu0 %vm4711_vm4, %v4712_v11  ;;  %v452_v19 = vsel %vm437_vm6, %v435_v13, %v223_v42  ;;  %v1895_v17 = vrot.slane %v4466_v28, %v5088_v31 }
  0xec   :  { %v1151_v60 = vcombine.high %v1149_v8, %v1149_v8  ;;  %v1172_v15 = vrot.slane %v1150_v9, %v5088_v31  ;;  %v1869_v39 = vcombine.low %v1860_v10, %v1867_v12  ;;  %v1165_v16 = vrot.slane %v1149_v8, %v5088_v31 }
  0xed   :  { %v312_v20 = vpop.permute.xlu0 %311  ;;  %v401_v21 = vpop.permute.xlu1 %400  ;;  %v1876_v25 = vrot.slane %v1868_v18, %v5088_v31 }
  0xee   :  { %v1179_v53 = vrot.slane %v1151_v60, %v5088_v31  ;;  %v1886_v22 = vcombine.low %v1158_v14, %v1172_v15  ;;  %v4467_v23 = vcombine.high %v1158_v14, %v1172_v15  ;;  %v469_v7 = vsel %vm454_vm7, %v452_v19, %v312_v20 }
  0xef   :  { %v486_v24 = vsel %vm471_vm8, %v469_v7, %v401_v21  ;;  %v1883_v26 = vrot.slane %v1869_v39, %v5088_v31  ;;  %v1181_v43 = vcombine.high %v1165_v16, %v1165_v16 }
  0xf0   :  { %v1888_v27 = vcombine.low %v1165_v16, %v1179_v53  ;;  %v1902_v30 = vrot.slane %v1886_v22, %v5088_v31  ;;  %v1183_v32 = vcombine.high %v486_v24, %v486_v24  ;;  %v1190_v33 = vrot.slane %v486_v24, %v5088_v31 }
  0xf1   :  { %v128_v38 = vpop.permute.xlu0 %127  ;;  %v225_v34 = vpop.permute.xlu1 %224  ;;  %v1884_v35 = vcombine.low %v1876_v25, %v1883_v26  ;;  %v1909_v36 = vrot.slane %v4467_v23, %v5088_v31 }
  0xf2   :  { %v1916_v37 = vrot.slane %v1888_v27, %v5088_v31  ;;  %v1197_v1 = vrot.slane %v1183_v32, %v5088_v31  ;;  %v436_v40 = vsel %vm420_vm5, %v5058_v54, %v128_v38  ;;  %v1917_v41 = vcombine.low %v1895_v17, %v1902_v30 }
  0xf3   :  { %v1198_v44 = vcombine.high %v1190_v33, %v1190_v33  ;;  %v1206_v45 = vrot.slane %v1190_v33, %v5088_v31  ;;  %4582 = vmatmul.mubr.msk.f32.gmra.mrb[22].mxu0 %vm2032_vm9, %v1884_v35  ;;  %v453_v54 = vsel %vm437_vm6, %v436_v40, %v225_v34 }
  0xf4   :  { %v1918_v46 = vcombine.low %v1909_v36, %v1916_v37  ;;  %v1199_v47 = vcombine.high %v1197_v1, %v1197_v1  ;;  %v1213_v48 = vrot.slane %v1197_v1, %v5088_v31  ;;  %4584 = vmatprep.mubr.msk.f32.mxu0 %vm4711_vm4, %v4712_v11  ;;  %v1925_v2 = vrot.slane %v1917_v41, %v5088_v31  ;;  %v3088_v1 = vld [vmem:[%s5965_s3] sm:$0xff] }
  0xf5   :  { %v1220_v62 = vrot.slane %v1198_v44, %v5088_v31  ;;  %v1228_v29 = vcombine.high %v1206_v45, %v1206_v45  ;;  %v1934_v49 = vcombine.low %v1181_v43, %v1206_v45  ;;  %v314_v50 = vpop.permute.xlu0 %313  ;;  %v403_v51 = vpop.permute.xlu1 %402  ;;  %v3092_v40 = vcombine.high %v3088_v1, %v3088_v1  ;;  %v5410_v43 = vld [vmem:[%s5964_s2] ss:$0 sm:$0xff] }
  0xf6   :  { %v1227_v6 = vrot.slane %v1199_v47, %v5088_v31  ;;  %v1229_v52 = vcombine.high %v1213_v48, %v1213_v48  ;;  %v470_v55 = vsel %vm454_vm7, %v453_v54, %v314_v50  ;;  %v1932_v56 = vrot.slane %v1918_v46, %v5088_v31  ;;  %v3089_v46 = vld [vmem:[%s5965_s3 + $0x8] sm:$0x7f] }
  0xf7   :  { %v1230_v57 = vcombine.high %v1220_v62, %v1220_v62  ;;  %v1935_v58 = vcombine.low %v1220_v62, %v1228_v29  ;;  %v487_v59 = vsel %vm471_vm8, %v470_v55, %v403_v51  ;;  %v1944_v4 = vrot.slane %v1934_v49, %v5088_v31 }
  0xf8   :  { %v1937_v63 = vcombine.low %v1227_v6, %v1229_v52  ;;  %v1232_v0 = vcombine.high %v487_v59, %v487_v59  ;;  %v1239_v42 = vrot.slane %v487_v59, %v5088_v31  ;;  %v1933_v8 = vcombine.low %v1925_v2, %v1932_v56 }
  0xf9   :  { %v1936_v3 = vcombine.low %v1230_v57, %v1213_v48  ;;  %v1951_v5 = vrot.slane %v1935_v58, %v5088_v31  ;;  %v1231_v14 = vcombine.high %v1227_v6, %v1227_v6  ;;  %v3099_v41 = vrot.slane %v3088_v1, %v5088_v31 }
  0xfa   :  { %v1965_v9 = vrot.slane %v1937_v63, %v5088_v31  ;;  %v1246_v10 = vrot.slane %v1232_v0, %v5088_v31  ;;  %v1247_v12 = vcombine.high %v1239_v42, %v1239_v42  ;;  %v1255_v13 = vrot.slane %v1239_v42, %v5088_v31  ;;  %4585 = vmatmul.mubr.msk.f32.gmra.mrb[24].mxu0 %vm2032_vm9, %v1933_v8 }
  0xfb   :  { %v1958_v18 = vrot.slane %v1936_v3, %v5088_v31  ;;  %v1966_v60 = vcombine.low %v1944_v4, %v1951_v5  ;;  %4587 = vmatprep.mubr.msk.f32.mxu0 %vm4711_vm4, %v4712_v11  ;;  %v3107_v45 = vcombine.high %v3099_v41, %v3099_v41  ;;  %v3141_v49 = vcombine.high %v3089_v46, %v3089_v46 }
  0xfc   :  { %v1248_v15 = vcombine.high %v1246_v10, %v1246_v10  ;;  %v1262_v39 = vrot.slane %v1246_v10, %v5088_v31  ;;  %v1269_v28 = vrot.slane %v1247_v12, %v5088_v31  ;;  %v1277_v16 = vcombine.high %v1255_v13, %v1255_v13 }
  0xfd   :  { %v1983_v19 = vcombine.low %v1231_v14, %v1255_v13  ;;  %v1967_v20 = vcombine.low %v1958_v18, %v1965_v9  ;;  %v1974_v7 = vrot.slane %v1966_v60, %v5088_v31  ;;  %v5418_v54 = vrot.slane %v3099_v41, %v5088_v31 }
  0xfe   :  { %v1276_v21 = vrot.slane %v1248_v15, %v5088_v31  ;;  %v1278_v53 = vcombine.high %v1262_v39, %v1262_v39  ;;  %v1279_v22 = vcombine.high %v1269_v28, %v1269_v28  ;;  %v1984_v23 = vcombine.low %v1269_v28, %v1277_v16 }
  0xff   :  { %v1981_v24 = vrot.slane %v1967_v20, %v5088_v31  ;;  %v1993_v27 = vrot.slane %v1983_v19, %v5088_v31  ;;  %v5421_v50 = vrot.slane %v3107_v45, %v5088_v31  ;;  %v3148_v56 = vrot.slane %v3089_v46, %v5088_v31  ;;  %v4301_v45 = vld [vmem:[%s5966_s4 + $0x8] sm:$0xff] }
 0x100   :  { %v1985_v25 = vcombine.low %v1279_v22, %v1262_v39  ;;  %v1986_v26 = vcombine.low %v1276_v21, %v1278_v53  ;;  %v2000_v30 = vrot.slane %v1984_v23, %v5088_v31  ;;  %v3155_v2 = vrot.slane %v3141_v49, %v5088_v31 }
 0x101   :  { %v1982_v32 = vcombine.low %v1974_v7, %v1981_v24  ;;  %v5436_v63 = vcombine.high %v5418_v54, %v5418_v54  ;;  %v5440_v0 = vcombine.high %v5421_v50, %v5421_v50  ;;  %v3156_v12 = vcombine.high %v3148_v56, %v3148_v56 }
 0x102   :  { %v2007_v17 = vrot.slane %v1985_v25, %v5088_v31  ;;  %v2014_v33 = vrot.slane %v1986_v26, %v5088_v31  ;;  %v2015_v38 = vcombine.low %v1993_v27, %v2000_v30  ;;  %v5453_v13 = vrot.slane %v3148_v56, %v5088_v31 }
 0x103   :  { %4588 = vmatmul.mubr.msk.f32.gmra.mrb[26].mxu0 %vm2032_vm9, %v1982_v32  ;;  %v3157_v15 = vcombine.high %v3155_v2, %v3155_v2  ;;  %v5460_v20 = vrot.slane %v3155_v2, %v5088_v31  ;;  %v5467_v25 = vrot.slane %v3156_v12, %v5088_v31 }
 0x104   :  { %4590 = vmatprep.mubr.msk.f32.mxu0 %vm4711_vm4, %v4712_v11  ;;  %v2016_v34 = vcombine.low %v2007_v17, %v2014_v33  ;;  %v2023_v35 = vrot.slane %v2015_v38, %v5088_v31  ;;  %v3106_v11 = vrot.slane %v3092_v40, %v5088_v31  ;;  %v5474_v38 = vcombine.high %v5453_v13, %v5453_v13 }
 0x106   :  { %v2030_v36 = vrot.slane %v2016_v34, %v5088_v31  ;;  %v3108_v62 = vcombine.high %v3106_v11, %v3106_v11  ;;  %v5425_v52 = vrot.slane %v3106_v11, %v5088_v31  ;;  %v5487_v11 = vcombine.high %v5467_v25, %v5467_v25 }
 0x108   :  { %v2031_v37 = vcombine.low %v2023_v35, %v2030_v36  ;;  %v5428_v55 = vrot.slane %v3108_v62, %v5088_v31  ;;  %v5446_v8 = vcombine.high %v5425_v52, %v5425_v52  ;;  %v5477_v36 = vrot.slane %v3157_v15, %v5088_v31 }
 0x10a   :  { %4591 = vmatmul.mubr.msk.f32.gmra.mrb[28].mxu0 %vm2032_vm9, %v2031_v37  ;;  %v5450_v9 = vcombine.high %v5428_v55, %v5428_v55  ;;  %v5481_v37 = vcombine.high %v5460_v20, %v5460_v20 }
 0x167   :  { %v2129_v44 = vpop.f32.mrb[0].mxu0 }
 0x168   :  { %v2130_v47 = vadd.f32 %v5410_v43, %v2129_v44  ;;  %v4550_v48 = vpop.f32.mrb[1].mxu0  ;;  %v4300_v44 = vld [vmem:[%s5966_s4] sm:$0xff] }
 0x169   :  { %v4644_v62 = vpack.c.bf16 %v4301_v45, %v4300_v44 }
 0x16a   :  { %v2203_v29 = vmax.f32 %v2130_v47, 0.0 }
 0x16b   :  { %4645 = vmatpush3.bf16.msra.mxu1 %v4644_v62 }
 0x16c   :  { %v2233_v51 = vcombine.high %v2203_v29, %v2203_v29  ;;  %v2240_v6 = vrot.slane %v2203_v29, %v5088_v31  ;;  %4646 = vmatprep.subr.bf16.mxu1 %v4710_v61 }
 0x16e   :  { %v2247_v57 = vrot.slane %v2233_v51, %v5088_v31  ;;  %v2248_v58 = vcombine.high %v2240_v6, %v2240_v6  ;;  %v2256_v59 = vrot.slane %v2240_v6, %v5088_v31 }
 0x170   :  { %v2249_v42 = vcombine.high %v2247_v57, %v2247_v57  ;;  %v2263_v3 = vrot.slane %v2247_v57, %v5088_v31  ;;  %v2270_v4 = vrot.slane %v2248_v58, %v5088_v31  ;;  %v2278_v5 = vcombine.high %v2256_v59, %v2256_v59 }
 0x171   :  { %v2134_v10 = vpop.f32.mrb[2].mxu0  ;;  %v3204_v7 = vmul.f32 %v5418_v54, %v2256_v59 }
 0x172   :  { %v2277_v18 = vrot.slane %v2249_v42, %v5088_v31  ;;  %v2279_v60 = vcombine.high %v2263_v3, %v2263_v3  ;;  %v2280_v14 = vcombine.high %v2270_v4, %v2270_v4  ;;  %v4553_v39 = vpop.f32.mrb[3].mxu0  ;;  %v3205_v28 = vmul.f32 %v5421_v50, %v2270_v4  ;;  %v4302_v4 = vld [vmem:[%s5966_s4 + $0x10] sm:$0xff] }
 0x173   :  { %v3206_v16 = vmul.f32 %v5436_v63, %v2278_v5  ;;  %v2135_v19 = vadd.f32 %v5410_v43, %v2134_v10  ;;  %v3208_v22 = vmul.f32 %v5425_v52, %v2263_v3  ;;  %v4303_v5 = vld [vmem:[%s5966_s4 + $0x18] sm:$0xff] }
 0x174   :  { %v2281_v21 = vcombine.high %v2277_v18, %v2277_v18  ;;  %v3207_v53 = vmul.f32 %v5440_v0, %v2280_v14  ;;  %v3209_v23 = vmul.f32 %v5428_v55, %v2277_v18  ;;  %v3210_v26 = vmul.f32 %v5446_v8, %v2279_v60 }
 0x175   :  { %v2204_v24 = vmax.f32 %v2135_v19, 0.0  ;;  %v3444_v34 = vcombine.low %v3204_v7, %v3205_v28 }
 0x176   :  { %v3211_v27 = vmul.f32 %v5450_v9, %v2281_v21  ;;  %v3445_v30 = vcombine.low %v3206_v16, %v3207_v53  ;;  %v3446_v32 = vcombine.low %v3208_v22, %v3209_v23  ;;  %v4647_v22 = vpack.c.bf16 %v4303_v5, %v4302_v4 }
 0x177   :  { %v2282_v17 = vcombine.high %v2204_v24, %v2204_v24  ;;  %v2289_v33 = vrot.slane %v2204_v24, %v5088_v31  ;;  %v3454_v56 = vrot.slane %v3444_v34, %v5088_v31 }
 0x178   :  { %v3447_v35 = vcombine.low %v3210_v26, %v3211_v27  ;;  %v3461_v46 = vrot.slane %v3445_v30, %v5088_v31  ;;  %v3468_v47 = vrot.slane %v3446_v32, %v5088_v31  ;;  %v4304_v26 = vld [vmem:[%s5966_s4 + $0x20] sm:$0xff]  ;;  %v4305_v27 = vld [vmem:[%s5966_s4 + $0x28] sm:$0xff]  ;;  %4648 = vmatpush3.bf16.msra.mxu1 %v4647_v22 }
 0x179   :  { %v2296_v1 = vrot.slane %v2282_v17, %v5088_v31  ;;  %v2297_v40 = vcombine.high %v2289_v33, %v2289_v33  ;;  %v2305_v41 = vrot.slane %v2289_v33, %v5088_v31  ;;  %v4650_v33 = vpack.c.bf16 %v4305_v27, %v4304_v26  ;;  %4649 = vmatprep.subr.bf16.mxu1 %v4710_v61 }
 0x17a   :  { %v3475_v48 = vrot.slane %v3447_v35, %v5088_v31  ;;  %v3476_v10 = vcombine.low %v3454_v56, %v3461_v46 }
 0x17b   :  { %v2298_v29 = vcombine.high %v2296_v1, %v2296_v1  ;;  %v2312_v49 = vrot.slane %v2296_v1, %v5088_v31  ;;  %v2319_v51 = vrot.slane %v2297_v40, %v5088_v31  ;;  %v2327_v6 = vcombine.high %v2305_v41, %v2305_v41 }
 0x17c   :  { %v3477_v57 = vcombine.low %v3468_v47, %v3475_v48  ;;  %v3212_v12 = vmul.f32 %v5453_v13, %v2305_v41  ;;  %v3484_v30 = vrot.slane %v3476_v10, %v5088_v31  ;;  %4651 = vmatpush3.bf16.msra.mxu1 %v4650_v33 }
 0x17d   :  { %v2326_v58 = vrot.slane %v2298_v29, %v5088_v31  ;;  %v2328_v59 = vcombine.high %v2312_v49, %v2312_v49  ;;  %v2329_v2 = vcombine.high %v2319_v51, %v2319_v51  ;;  %v3213_v42 = vmul.f32 %v5467_v25, %v2319_v51  ;;  %4652 = vmatprep.subr.bf16.mxu1 %v4710_v61 }
 0x17e   :  { %v2139_v3 = vpop.f32.mrb[4].mxu0  ;;  %v3214_v18 = vmul.f32 %v5474_v38, %v2327_v6  ;;  %v3216_v39 = vmul.f32 %v5460_v20, %v2312_v49  ;;  %v3491_v19 = vrot.slane %v3477_v57, %v5088_v31 }
 0x17f   :  { %v2140_v60 = vadd.f32 %v5410_v43, %v2139_v3  ;;  %v4556_v14 = vpop.f32.mrb[5].mxu0  ;;  %v3215_v15 = vmul.f32 %v5487_v11, %v2329_v2  ;;  %v3217_v28 = vmul.f32 %v5477_v36, %v2326_v58  ;;  %v3218_v16 = vmul.f32 %v5481_v37, %v2328_v59 }
 0x180   :  { %v3493_v21 = vcombine.low %v3212_v12, %v3213_v42  ;;  %v2330_v23 = vcombine.high %v2326_v58, %v2326_v58  ;;  %v3492_v41 = vcombine.low %v3484_v30, %v3491_v19 }
 0x181   :  { %v2205_v53 = vmax.f32 %v2140_v60, 0.0  ;;  %v3494_v7 = vcombine.low %v3214_v18, %v3215_v15  ;;  %v3495_v24 = vcombine.low %v3216_v39, %v3217_v28  ;;  %v3523_v40 = vrot.slane %v3218_v16, %v5088_v31 }
 0x182   :  { %v3502_v34 = vrot.slane %v3493_v21, %v5088_v31  ;;  %v3219_v29 = vmul.f32 %v5418_v54, %v2330_v23 }
 0x183   :  { %v2331_v32 = vcombine.high %v2205_v53, %v2205_v53  ;;  %v2338_v17 = vrot.slane %v2205_v53, %v5088_v31  ;;  %v3509_v35 = vrot.slane %v3494_v7, %v5088_v31  ;;  %v3516_v1 = vrot.slane %v3495_v24, %v5088_v31 }
 0x185   :  { %v2345_v44 = vrot.slane %v2331_v32, %v5088_v31  ;;  %v2346_v45 = vcombine.high %v2338_v17, %v2338_v17  ;;  %v2354_v46 = vrot.slane %v2338_v17, %v5088_v31  ;;  %v2144_v47 = vpop.f32.mrb[6].mxu0  ;;  %v3524_v48 = vcombine.low %v3502_v34, %v3509_v35 }
 0x186   :  { %v3525_v62 = vcombine.low %v3516_v1, %v3523_v40  ;;  %v2145_v49 = vadd.f32 %v5410_v43, %v2144_v47  ;;  %v4559_v51 = vpop.f32.mrb[7].mxu0 }
 0x187   :  { %v2347_v6 = vcombine.high %v2345_v44, %v2345_v44  ;;  %v2361_v56 = vrot.slane %v2345_v44, %v5088_v31  ;;  %v2368_v57 = vrot.slane %v2346_v45, %v5088_v31  ;;  %v2376_v58 = vcombine.high %v2354_v46, %v2354_v46 }
 0x188   :  { %v3532_v59 = vrot.slane %v3524_v48, %v5088_v31  ;;  %v3539_v2 = vrot.slane %v3525_v62, %v5088_v31  ;;  %v3220_v42 = vmul.f32 %v5421_v50, %v2354_v46  ;;  %v2206_v3 = vmax.f32 %v2145_v49, 0.0 }
 0x189   :  { %v2375_v4 = vrot.slane %v2347_v6, %v5088_v31  ;;  %v2377_v5 = vcombine.high %v2361_v56, %v2361_v56  ;;  %v2378_v10 = vcombine.high %v2368_v57, %v2368_v57  ;;  %v3221_v12 = vmul.f32 %v5436_v63, %v2368_v57 }
 0x18a   :  { %v3540_v18 = vcombine.low %v3532_v59, %v3539_v2  ;;  %v3222_v60 = vmul.f32 %v5440_v0, %v2376_v58  ;;  %v3224_v14 = vmul.f32 %v5428_v55, %v2361_v56  ;;  %v3541_v15 = vcombine.low %v3219_v29, %v3220_v42 }
 0x18b   :  { %v2379_v39 = vcombine.high %v2375_v4, %v2375_v4  ;;  %v3223_v28 = vmul.f32 %v5425_v52, %v2378_v10  ;;  %v3225_v16 = vmul.f32 %v5446_v8, %v2375_v4  ;;  %v3226_v19 = vmul.f32 %v5450_v9, %v2377_v5  ;;  %v2149_v7 = vpop.f32.mrb[8].mxu0 }
 0x18c   :  { %v4236_v21 = vsel %vm72_vm1, %v3540_v18, -inf  ;;  %v3542_v53 = vcombine.low %v3221_v12, %v3222_v60  ;;  %v3551_v22 = vrot.slane %v3541_v15, %v5088_v31  ;;  %v2380_v23 = vcombine.high %v2206_v3, %v2206_v3  ;;  %v4562_v32 = vpop.f32.mrb[9].mxu0 }
 0x18d   :  { %v4237_v24 = vmax.f32 %v3492_v41, %v4236_v21  ;;  %v3543_v26 = vcombine.low %v3223_v28, %v3224_v14  ;;  %v3544_v27 = vcombine.low %v3225_v16, %v3226_v19  ;;  %v2387_v30 = vrot.slane %v2206_v3, %v5088_v31  ;;  %v4306_v28 = vld [vmem:[%s5966_s4 + $0x30] sm:$0xff]  ;;  %v4307_v16 = vld [vmem:[%s5966_s4 + $0x38] sm:$0xff] }
 0x18e   :  { %v3558_v17 = vrot.slane %v3542_v53, %v5088_v31  ;;  %v2394_v33 = vrot.slane %v2380_v23, %v5088_v31  ;;  %v3227_v34 = vmul.f32 %v5453_v13, %v2379_v39  ;;  %v2150_v35 = vadd.f32 %v5410_v43, %v2149_v7 }
 0x18f   :  { %v4238_v1 = vrot.slane %v4237_v24, 4  ;;  %v3565_v40 = vrot.slane %v3543_v26, %v5088_v31  ;;  %v3572_v44 = vrot.slane %v3544_v27, %v5088_v31  ;;  %v2395_v45 = vcombine.high %v2387_v30, %v2387_v30 }
 0x190   :  { %v3573_v41 = vcombine.low %v3551_v22, %v3558_v17  ;;  %v2396_v46 = vcombine.high %v2394_v33, %v2394_v33  ;;  %v2403_v47 = vrot.slane %v2387_v30, %v5088_v31  ;;  %v2410_v48 = vrot.slane %v2394_v33, %v5088_v31 }
 0x191   :  { %v5559_v62 = vmax.f32 %v4237_v24, %v4238_v1  ;;  %v3574_v29 = vcombine.low %v3565_v40, %v3572_v44  ;;  %v2417_v49 = vrot.slane %v2395_v45, %v5088_v31  ;;  %v2207_v51 = vmax.f32 %v2150_v35, 0.0 }
 0x192   :  { %v5563_v6 = vrot.slane %v3573_v41, %v5088_v31  ;;  %v2424_v56 = vrot.slane %v2396_v46, %v5088_v31  ;;  %v2425_v57 = vcombine.high %v2403_v47, %v2403_v47  ;;  %v2426_v58 = vcombine.high %v2410_v48, %v2410_v48 }
 0x193   :  { %v5567_v59 = vrot.slane %v3574_v29, %v5088_v31  ;;  %v2427_v2 = vcombine.high %v2417_v49, %v2417_v49  ;;  %v3228_v42 = vmul.f32 %v5467_v25, %v2403_v47  ;;  %v3229_v3 = vmul.f32 %v5474_v38, %v2417_v49 }
 0x194   :  { %v2428_v4 = vcombine.high %v2424_v56, %v2424_v56  ;;  %v3230_v5 = vmul.f32 %v5487_v11, %v2425_v57  ;;  %v3232_v10 = vmul.f32 %v5477_v36, %v2410_v48  ;;  %v3233_v12 = vmul.f32 %v5481_v37, %v2424_v56  ;;  %v2154_v39 = vpop.f32.mrb[10].mxu0 }
 0x195   :  { %v3589_v18 = vcombine.low %v5563_v6, %v5567_v59  ;;  %v3231_v60 = vmul.f32 %v5460_v20, %v2427_v2  ;;  %v3234_v14 = vmul.f32 %v5418_v54, %v2426_v58  ;;  %v3590_v15 = vcombine.low %v3227_v34, %v3228_v42  ;;  %v4565_v23 = vpop.f32.mrb[11].mxu0 }
 0x196   :  { %v3235_v19 = vmul.f32 %v5421_v50, %v2428_v4  ;;  %v3591_v21 = vcombine.low %v3229_v3, %v3230_v5  ;;  %v3620_v53 = vrot.slane %v3233_v12, %v5088_v31  ;;  %v2429_v22 = vcombine.high %v2207_v51, %v2207_v51 }
 0x197   :  { %v3592_v7 = vcombine.low %v3231_v60, %v3232_v10  ;;  %v3599_v24 = vrot.slane %v3590_v15, %v5088_v31  ;;  %v2436_v26 = vrot.slane %v2207_v51, %v5088_v31  ;;  %v2155_v27 = vadd.f32 %v5410_v43, %v2154_v39 }
 0x198   :  { %v3606_v30 = vrot.slane %v3591_v21, %v5088_v31  ;;  %v3638_v32 = vcombine.low %v3234_v14, %v3235_v19  ;;  %v2443_v17 = vrot.slane %v2429_v22, %v5088_v31  ;;  %v4653_v33 = vpack.c.bf16 %v4307_v16, %v4306_v28 }
 0x199   :  { %v3613_v34 = vrot.slane %v3592_v7, %v5088_v31  ;;  %v2444_v35 = vcombine.high %v2436_v26, %v2436_v26  ;;  %v2452_v1 = vrot.slane %v2436_v26, %v5088_v31  ;;  %v2208_v40 = vmax.f32 %v2155_v27, 0.0 }
 0x19a   :  { %v3621_v44 = vcombine.low %v3599_v24, %v3606_v30  ;;  %v2445_v45 = vcombine.high %v2443_v17, %v2443_v17  ;;  %v2459_v41 = vrot.slane %v2443_v17, %v5088_v31  ;;  %v3648_v46 = vrot.slane %v3638_v32, %v5088_v31  ;;  %4654 = vmatpush3.bf16.msra.mxu1 %v4653_v33 }
 0x19b   :  { %v3622_v47 = vcombine.low %v3613_v34, %v3620_v53  ;;  %v2466_v48 = vrot.slane %v2444_v35, %v5088_v31  ;;  %v2474_v29 = vcombine.high %v2452_v1, %v2452_v1  ;;  %v3236_v49 = vmul.f32 %v5436_v63, %v2452_v1  ;;  %4655 = vmatprep.subr.bf16.mxu1 %v4710_v61 }
 0x19c   :  { %v3629_v51 = vrot.slane %v3621_v44, %v5088_v31  ;;  %v2473_v6 = vrot.slane %v2445_v45, %v5088_v31  ;;  %v2475_v56 = vcombine.high %v2459_v41, %v2459_v41  ;;  %v3240_v57 = vmul.f32 %v5446_v8, %v2459_v41  ;;  %v2159_v58 = vpop.f32.mrb[12].mxu0 }
 0x19d   :  { %v3636_v59 = vrot.slane %v3622_v47, %v5088_v31  ;;  %v2476_v2 = vcombine.high %v2466_v48, %v2466_v48  ;;  %v3237_v42 = vmul.f32 %v5440_v0, %v2466_v48  ;;  %v3238_v3 = vmul.f32 %v5425_v52, %v2474_v29  ;;  %v4568_v4 = vpop.f32.mrb[13].mxu0 }
 0x19e   :  { %v2477_v5 = vcombine.high %v2473_v6, %v2473_v6  ;;  %v3241_v10 = vmul.f32 %v5450_v9, %v2473_v6  ;;  %v3242_v12 = vmul.f32 %v5453_v13, %v2475_v56  ;;  %v2478_v60 = vcombine.high %v2208_v40, %v2208_v40 }
 0x19f   :  { %v3637_v14 = vcombine.low %v3629_v51, %v3636_v59  ;;  %v3239_v15 = vmul.f32 %v5428_v55, %v2476_v2  ;;  %v3639_v39 = vcombine.low %v3236_v49, %v3237_v42  ;;  %v2485_v28 = vrot.slane %v2208_v40, %v5088_v31  ;;  %v4308_v42 = vld [vmem:[%s5966_s4 + $0x40] sm:$0xff] }
 0x1a0   :  { %v3243_v16 = vmul.f32 %v5467_v25, %v2477_v5  ;;  %v3641_v19 = vcombine.low %v3240_v57, %v3241_v10  ;;  %v2492_v21 = vrot.slane %v2478_v60, %v5088_v31  ;;  %v2160_v53 = vadd.f32 %v5410_v43, %v2159_v58  ;;  %v4310_v60 = vld [vmem:[%s5966_s4 + $0x50] sm:$0xff] }
 0x1a1   :  { %v4244_v22 = vsel %vm72_vm1, %v3637_v14, -inf  ;;  %v3640_v23 = vcombine.low %v3238_v3, %v3239_v15  ;;  %v3655_v7 = vrot.slane %v3639_v39, %v5088_v31  ;;  %v2493_v24 = vcombine.high %v2485_v28, %v2485_v28  ;;  %v4311_v14 = vld [vmem:[%s5966_s4 + $0x58] sm:$0xff] }
 0x1a2   :  { %v4245_v26 = vmax.f32 %v3589_v18, %v4244_v22  ;;  %v3669_v27 = vrot.slane %v3641_v19, %v5088_v31  ;;  %v3687_v30 = vcombine.low %v3242_v12, %v3243_v16  ;;  %v2494_v32 = vcombine.high %v2492_v21, %v2492_v21  ;;  %v4309_v12 = vld [vmem:[%s5966_s4 + $0x48] sm:$0xff] }
 0x1a3   :  { %v3662_v17 = vrot.slane %v3640_v23, %v5088_v31  ;;  %v3670_v33 = vcombine.low %v3648_v46, %v3655_v7  ;;  %v2501_v34 = vrot.slane %v2485_v28, %v5088_v31  ;;  %v2508_v35 = vrot.slane %v2492_v21, %v5088_v31  ;;  %v2164_v29 = vpop.f32.mrb[14].mxu0  ;;  %v4312_v23 = vld [vmem:[%s5966_s4 + $0x60] sm:$0xff]  ;;  %v4313_v7 = vld [vmem:[%s5966_s4 + $0x68] sm:$0xff] }
 0x1a4   :  { %v4246_v1 = vrot.slane %v4245_v26, 4  ;;  %v2515_v40 = vrot.slane %v2493_v24, %v5088_v31  ;;  %v2522_v44 = vrot.slane %v2494_v32, %v5088_v31  ;;  %v3696_v45 = vrot.slane %v3687_v30, %v5088_v31  ;;  %v4571_v56 = vpop.f32.mrb[15].mxu0 }
 0x1a5   :  { %v3671_v41 = vcombine.low %v3662_v17, %v3669_v27  ;;  %v5621_v18 = vrot.slane %v3670_v33, %v5088_v31  ;;  %v2523_v47 = vcombine.high %v2501_v34, %v2501_v34  ;;  %v2524_v48 = vcombine.high %v2508_v35, %v2508_v35 }
 0x1a6   :  { %v5623_v49 = vmax.f32 %v4245_v26, %v4246_v1  ;;  %v2525_v46 = vcombine.high %v2515_v40, %v2515_v40  ;;  %v2526_v51 = vcombine.high %v2522_v44, %v2522_v44  ;;  %v3244_v6 = vmul.f32 %v5474_v38, %v2501_v34 }
 0x1a7   :  { %v5627_v57 = vrot.slane %v3671_v41, %v5088_v31  ;;  %v3245_v58 = vmul.f32 %v5487_v11, %v2515_v40  ;;  %v3246_v59 = vmul.f32 %v5460_v20, %v2523_v47  ;;  %v3248_v2 = vmul.f32 %v5481_v37, %v2508_v35 }
 0x1a8   :  { %v3247_v3 = vmul.f32 %v5477_v36, %v2525_v46  ;;  %v3249_v4 = vmul.f32 %v5418_v54, %v2522_v44  ;;  %v3250_v5 = vmul.f32 %v5421_v50, %v2524_v48  ;;  %v2209_v10 = vmax.f32 %v2160_v53, 0.0 }
 0x1a9   :  { %v3686_v15 = vcombine.low %v5621_v18, %v5627_v57  ;;  %v3688_v39 = vcombine.low %v3244_v6, %v3245_v58  ;;  %v3717_v28 = vrot.slane %v3248_v2, %v5088_v31  ;;  %v3251_v16 = vmul.f32 %v5436_v63, %v2526_v51 }
 0x1aa   :  { %v3689_v19 = vcombine.low %v3246_v59, %v3247_v3  ;;  %v3735_v21 = vcombine.low %v3249_v4, %v3250_v5  ;;  %v2527_v53 = vcombine.high %v2209_v10, %v2209_v10  ;;  %v2534_v22 = vrot.slane %v2209_v10, %v5088_v31 }
 0x1ab   :  { %v3703_v24 = vrot.slane %v3688_v39, %v5088_v31  ;;  %v2165_v26 = vadd.f32 %v5410_v43, %v2164_v29  ;;  %v4656_v27 = vpack.c.bf16 %v4309_v12, %v4308_v42  ;;  %v4659_v30 = vpack.c.bf16 %v4311_v14, %v4310_v60 }
 0x1ac   :  { %v3710_v32 = vrot.slane %v3689_v19, %v5088_v31  ;;  %v2541_v17 = vrot.slane %v2527_v53, %v5088_v31  ;;  %v2542_v33 = vcombine.high %v2534_v22, %v2534_v22  ;;  %v2550_v34 = vrot.slane %v2534_v22, %v5088_v31 }
 0x1ad   :  { %v3718_v35 = vcombine.low %v3696_v45, %v3703_v24  ;;  %v3745_v1 = vrot.slane %v3735_v21, %v5088_v31  ;;  %v2210_v40 = vmax.f32 %v2165_v26, 0.0  ;;  %4657 = vmatpush3.bf16.msra.mxu1 %v4656_v27  ;;  %v4662_v44 = vpack.c.bf16 %v4313_v7, %v4312_v23 }
 0x1ae   :  { %v3719_v41 = vcombine.low %v3710_v32, %v3717_v28  ;;  %v2543_v18 = vcombine.high %v2541_v17, %v2541_v17  ;;  %v2557_v47 = vrot.slane %v2541_v17, %v5088_v31  ;;  %v2564_v48 = vrot.slane %v2542_v33, %v5088_v31  ;;  %4658 = vmatprep.subr.bf16.mxu1 %v4710_v61  ;;  %v2169_v45 = vpop.f32.mrb[16].mxu0 }
 0x1af   :  { %v3726_v29 = vrot.slane %v3718_v35, %v5088_v31  ;;  %v2572_v46 = vcombine.high %v2550_v34, %v2550_v34  ;;  %v3252_v51 = vmul.f32 %v5440_v0, %v2550_v34  ;;  %v2576_v6 = vcombine.high %v2210_v40, %v2210_v40  ;;  %v4574_v2 = vpop.f32.mrb[17].mxu0 }
 0x1b0   :  { %v3733_v56 = vrot.slane %v3719_v41, %v5088_v31  ;;  %v2571_v57 = vrot.slane %v2543_v18, %v5088_v31  ;;  %v2573_v58 = vcombine.high %v2557_v47, %v2557_v47  ;;  %v2574_v59 = vcombine.high %v2564_v48, %v2564_v48 }
 0x1b1   :  { %v3253_v42 = vmul.f32 %v5425_v52, %v2564_v48  ;;  %v3254_v3 = vmul.f32 %v5428_v55, %v2572_v46  ;;  %v3256_v4 = vmul.f32 %v5450_v9, %v2557_v47  ;;  %v3736_v5 = vcombine.low %v3251_v16, %v3252_v51  ;;  %4660 = vmatpush3.bf16.msra.mxu1 %v4659_v30 }
 0x1b2   :  { %v3734_v10 = vcombine.low %v3726_v29, %v3733_v56  ;;  %v2575_v12 = vcombine.high %v2571_v57, %v2571_v57  ;;  %v3255_v60 = vmul.f32 %v5446_v8, %v2574_v59  ;;  %v3257_v14 = vmul.f32 %v5453_v13, %v2571_v57  ;;  %4661 = vmatprep.subr.bf16.mxu1 %v4710_v61 }
 0x1b3   :  { %v3258_v39 = vmul.f32 %v5467_v25, %v2573_v58  ;;  %v3737_v28 = vcombine.low %v3253_v42, %v3254_v3  ;;  %v3752_v19 = vrot.slane %v3736_v5, %v5088_v31  ;;  %v2583_v21 = vrot.slane %v2210_v40, %v5088_v31 }
 0x1b4   :  { %v4252_v53 = vsel %vm72_vm1, %v3734_v10, -inf  ;;  %v3738_v22 = vcombine.low %v3255_v60, %v3256_v4  ;;  %v2590_v16 = vrot.slane %v2576_v6, %v5088_v31  ;;  %v3259_v23 = vmul.f32 %v5474_v38, %v2575_v12 }
 0x1b5   :  { %v5683_v7 = vmax.f32 %v3686_v15, %v4252_v53  ;;  %v3759_v24 = vrot.slane %v3737_v28, %v5088_v31  ;;  %v3767_v26 = vcombine.low %v3745_v1, %v3752_v19  ;;  %v3784_v27 = vcombine.low %v3257_v14, %v3258_v39  ;;  %v2174_v30 = vpop.f32.mrb[18].mxu0  ;;  %4663 = vmatpush3.bf16.msra.mxu1 %v4662_v44 }
 0x1b6   :  { %v3766_v32 = vrot.slane %v3738_v22, %v5088_v31  ;;  %v2591_v17 = vcombine.high %v2583_v21, %v2583_v21  ;;  %v2592_v33 = vcombine.high %v2590_v16, %v2590_v16  ;;  %v2599_v34 = vrot.slane %v2583_v21, %v5088_v31  ;;  %v4577_v35 = vpop.f32.mrb[19].mxu0  ;;  %4664 = vmatprep.subr.bf16.mxu1 %v4710_v61 }
 0x1b7   :  { %v4254_v40 = vrot.slane %v5683_v7, 4  ;;  %v5691_v15 = vrot.slane %v3767_v26, %v5088_v31  ;;  %v2606_v41 = vrot.slane %v2590_v16, %v5088_v31  ;;  %v3793_v1 = vrot.slane %v3784_v27, %v5088_v31 }
 0x1b8   :  { %v3768_v18 = vcombine.low %v3759_v24, %v3766_v32  ;;  %v2613_v44 = vrot.slane %v2591_v17, %v5088_v31  ;;  %v2620_v47 = vrot.slane %v2592_v33, %v5088_v31  ;;  %v2621_v48 = vcombine.high %v2599_v34, %v2599_v34 }
 0x1b9   :  { %v2622_v29 = vcombine.high %v2606_v41, %v2606_v41  ;;  %v3260_v46 = vmul.f32 %v5487_v11, %v2599_v34  ;;  %v3264_v61 = vmul.f32 %v5418_v54, %v2606_v41  ;;  %v2170_v51 = vadd.f32 %v5410_v43, %v2169_v45 }
 0x1ba   :  { %v3782_v6 = vrot.slane %v3768_v18, %v5088_v31  ;;  %v2623_v56 = vcombine.high %v2613_v44, %v2613_v44  ;;  %v2624_v57 = vcombine.high %v2620_v47, %v2620_v47  ;;  %v3261_v58 = vmul.f32 %v5460_v20, %v2613_v44 }
 0x1bb   :  { %v3262_v59 = vmul.f32 %v5477_v36, %v2621_v48  ;;  %v3265_v2 = vmul.f32 %v5421_v50, %v2620_v47  ;;  %v3266_v42 = vmul.f32 %v5436_v63, %v2622_v29  ;;  %v3785_v3 = vcombine.low %v3259_v23, %v3260_v46 }
 0x1bc   :  { %v3783_v4 = vcombine.low %v5691_v15, %v3782_v6  ;;  %v3263_v5 = vmul.f32 %v5481_v37, %v2623_v56  ;;  %v3267_v10 = vmul.f32 %v5440_v0, %v2624_v57  ;;  %v2211_v45 = vmax.f32 %v2170_v51, 0.0 }
 0x1bd   :  { %v3786_v12 = vcombine.low %v3261_v58, %v3262_v59  ;;  %v3800_v60 = vrot.slane %v3785_v3, %v5088_v31  ;;  %v3832_v14 = vcombine.low %v3264_v61, %v3265_v2  ;;  %v2175_v39 = vadd.f32 %v5410_v43, %v2174_v30  ;;  %v5712_v22 = vpop.f32.mrb[20].mxu0 }
 0x1be   :  { %v3814_v28 = vrot.slane %v3263_v5, %v5088_v31  ;;  %v3833_v19 = vcombine.low %v3266_v42, %v3267_v10  ;;  %v2625_v21 = vcombine.high %v2211_v45, %v2211_v45  ;;  %v2632_v53 = vrot.slane %v2211_v45, %v5088_v31  ;;  %v4580_v27 = vpop.f32.mrb[21].mxu0 }
 0x1bf   :  { %v3807_v16 = vrot.slane %v3786_v12, %v5088_v31  ;;  %v3815_v23 = vcombine.low %v3793_v1, %v3800_v60  ;;  %v3842_v24 = vrot.slane %v3832_v14, %v5088_v31  ;;  %v2212_v26 = vmax.f32 %v2175_v39, 0.0 }
 0x1c0   :  { %v3849_v32 = vrot.slane %v3833_v19, %v5088_v31  ;;  %v2639_v17 = vrot.slane %v2625_v21, %v5088_v31  ;;  %v2640_v30 = vcombine.high %v2632_v53, %v2632_v53  ;;  %v2648_v33 = vrot.slane %v2632_v53, %v5088_v31 }
 0x1c1   :  { %v3816_v34 = vcombine.low %v3807_v16, %v3814_v28  ;;  %v3823_v35 = vrot.slane %v3815_v23, %v5088_v31  ;;  %v2674_v15 = vcombine.high %v2212_v26, %v2212_v26  ;;  %v2681_v41 = vrot.slane %v2212_v26, %v5088_v31 }
 0x1c2   :  { %v3864_v18 = vcombine.low %v3842_v24, %v3849_v32  ;;  %v2641_v44 = vcombine.high %v2639_v17, %v2639_v17  ;;  %v2655_v1 = vrot.slane %v2639_v17, %v5088_v31  ;;  %v2662_v47 = vrot.slane %v2640_v30, %v5088_v31 }
 0x1c3   :  { %v3830_v48 = vrot.slane %v3816_v34, %v5088_v31  ;;  %v2670_v29 = vcombine.high %v2648_v33, %v2648_v33  ;;  %v3268_v46 = vmul.f32 %v5425_v52, %v2648_v33  ;;  %v2688_v61 = vrot.slane %v2674_v15, %v5088_v31 }
 0x1c4   :  { %v5727_v51 = vrot.slane %v3864_v18, %v5088_v31  ;;  %v2669_v6 = vrot.slane %v2641_v44, %v5088_v31  ;;  %v2671_v56 = vcombine.high %v2655_v1, %v2655_v1  ;;  %v2672_v57 = vcombine.high %v2662_v47, %v2662_v47 }
 0x1c5   :  { %v3831_v58 = vcombine.low %v3823_v35, %v3830_v48  ;;  %v3269_v59 = vmul.f32 %v5428_v55, %v2662_v47  ;;  %v3270_v2 = vmul.f32 %v5446_v8, %v2670_v29  ;;  %v3272_v42 = vmul.f32 %v5453_v13, %v2655_v1 }
 0x1c6   :  { %v2673_v3 = vcombine.high %v2669_v6, %v2669_v6  ;;  %v3271_v5 = vmul.f32 %v5450_v9, %v2672_v57  ;;  %v3273_v10 = vmul.f32 %v5467_v25, %v2669_v6  ;;  %v3274_v45 = vmul.f32 %v5474_v38, %v2671_v56  ;;  %v2184_v12 = vpop.f32.mrb[22].mxu0 }
 0x1c7   :  { %v4260_v60 = vsel %vm72_vm1, %v3831_v58, -inf  ;;  %v3834_v14 = vcombine.low %v3268_v46, %v3269_v59  ;;  %v2689_v39 = vcombine.high %v2681_v41, %v2681_v41  ;;  %v2690_v28 = vcombine.high %v2688_v61, %v2688_v61  ;;  %v4583_v19 = vpop.f32.mrb[23].mxu0 }
 0x1c8   :  { %v5737_v21 = vmax.f32 %v3783_v4, %v4260_v60  ;;  %v3275_v53 = vmul.f32 %v5487_v11, %v2673_v3  ;;  %v3835_v16 = vcombine.low %v3270_v2, %v3271_v5  ;;  %v3881_v23 = vcombine.low %v3272_v42, %v3273_v10  ;;  %v4315_v60 = vld [vmem:[%s5966_s4 + $0x78] sm:$0xff] }
 0x1c9   :  { %v3856_v24 = vrot.slane %v3834_v14, %v5088_v31  ;;  %v2697_v26 = vrot.slane %v2681_v41, %v5088_v31  ;;  %v2704_v27 = vrot.slane %v2688_v61, %v5088_v31  ;;  %v2711_v32 = vrot.slane %v2689_v39, %v5088_v31 }
 0x1ca   :  { %v3863_v17 = vrot.slane %v3835_v16, %v5088_v31  ;;  %v3882_v30 = vcombine.low %v3274_v45, %v3275_v53  ;;  %v3890_v33 = vrot.slane %v3881_v23, %v5088_v31  ;;  %v2718_v4 = vrot.slane %v2690_v28, %v5088_v31  ;;  %v4314_v45 = vld [vmem:[%s5966_s4 + $0x70] sm:$0xff] }
 0x1cb   :  { %v2719_v34 = vcombine.high %v2697_v26, %v2697_v26  ;;  %v2720_v35 = vcombine.high %v2704_v27, %v2704_v27  ;;  %v2721_v15 = vcombine.high %v2711_v32, %v2711_v32  ;;  %v3276_v18 = vmul.f32 %v5460_v20, %v2697_v26 }
 0x1cc   :  { %v3865_v44 = vcombine.low %v3856_v24, %v3863_v17  ;;  %v3897_v1 = vrot.slane %v3882_v30, %v5088_v31  ;;  %v2722_v41 = vcombine.high %v2718_v4, %v2718_v4  ;;  %v3277_v47 = vmul.f32 %v5477_v36, %v2711_v32 }
 0x1cd   :  { %v3278_v48 = vmul.f32 %v5481_v37, %v2719_v34  ;;  %v3279_v29 = vmul.f32 %v5418_v54, %v2721_v15  ;;  %v3280_v46 = vmul.f32 %v5421_v50, %v2704_v27  ;;  %v3281_v61 = vmul.f32 %v5436_v63, %v2718_v4  ;;  %v2189_v59 = vpop.f32.mrb[24].mxu0 }
 0x1ce   :  { %v5755_v6 = vrot.slane %v3865_v44, %v5088_v31  ;;  %v3912_v56 = vcombine.low %v3890_v33, %v3897_v1  ;;  %v3282_v57 = vmul.f32 %v5440_v0, %v2720_v35  ;;  %v3883_v58 = vcombine.low %v3276_v18, %v3277_v47  ;;  %v4586_v10 = vpop.f32.mrb[25].mxu0 }
 0x1cf   :  { %v3911_v2 = vrot.slane %v3278_v48, %v5088_v31  ;;  %v3929_v42 = vcombine.low %v3279_v29, %v3280_v46  ;;  %v2180_v3 = vadd.f32 %v5410_v43, %v5712_v22  ;;  %v3283_v5 = vmul.f32 %v5425_v52, %v2722_v41 }
 0x1d0   :  { %v3880_v14 = vcombine.low %v5727_v51, %v5755_v6  ;;  %v3920_v39 = vrot.slane %v3912_v56, %v5088_v31  ;;  %v3904_v28 = vrot.slane %v3883_v58, %v5088_v31  ;;  %v3930_v19 = vcombine.low %v3281_v61, %v3282_v57 }
 0x1d1   :  { %v3939_v22 = vrot.slane %v3929_v42, %v5088_v31  ;;  %v2213_v53 = vmax.f32 %v2180_v3, 0.0  ;;  %v2185_v16 = vadd.f32 %v5410_v43, %v2184_v12  ;;  %v2190_v23 = vadd.f32 %v5410_v43, %v2189_v59 }
 0x1d2   :  { %v3913_v24 = vcombine.low %v3904_v28, %v3911_v2  ;;  %v3946_v26 = vrot.slane %v3930_v19, %v5088_v31  ;;  %v4665_v27 = vpack.c.bf16 %v4315_v60, %v4314_v45  ;;  %v4240_v32 = vrot.slane %v5559_v62, 2 }
 0x1d3   :  { %v2723_v17 = vcombine.high %v2213_v53, %v2213_v53  ;;  %v2730_v30 = vrot.slane %v2213_v53, %v5088_v31  ;;  %v2214_v33 = vmax.f32 %v2185_v16, 0.0  ;;  %v5778_v4 = vmax.f32 %v2190_v23, 0.0 }
 0x1d4   :  { %v3927_v34 = vrot.slane %v3913_v24, %v5088_v31  ;;  %v3961_v35 = vcombine.low %v3939_v22, %v3946_v26  ;;  %4666 = vmatpush3.bf16.msra.mxu1 %v4665_v27  ;;  %v5782_v12 = vmax.f32 %v5559_v62, %v4240_v32  ;;  %v4248_v43 = vrot.slane %v5623_v49, 2 }
 0x1d5   :  { %v2737_v15 = vrot.slane %v2723_v17, %v5088_v31  ;;  %v2738_v18 = vcombine.high %v2730_v30, %v2730_v30  ;;  %v2746_v44 = vrot.slane %v2730_v30, %v5088_v31  ;;  %v2772_v1 = vcombine.high %v2214_v33, %v2214_v33 }
 0x1d6   :  { %v3928_v41 = vcombine.low %v3920_v39, %v3927_v34  ;;  %v5788_v47 = vrot.slane %v3961_v35, %v5088_v31  ;;  %v2779_v48 = vrot.slane %v2214_v33, %v5088_v31  ;;  %v2821_v29 = vcombine.high %v5778_v4, %v5778_v4  ;;  %v5793_v46 = vpop.f32.mrb[26].mxu0 }
 0x1d7   :  { %v2739_v62 = vcombine.high %v2737_v15, %v2737_v15  ;;  %v2753_v61 = vrot.slane %v2737_v15, %v5088_v31  ;;  %v2760_v56 = vrot.slane %v2738_v18, %v5088_v31  ;;  %v2768_v57 = vcombine.high %v2746_v44, %v2746_v44  ;;  %v4589_v58 = vpop.f32.mrb[27].mxu0 }
 0x1d8   :  { %v5798_v59 = vsel %vm72_vm1, %v3928_v41, -inf  ;;  %v3284_v2 = vmul.f32 %v5428_v55, %v2746_v44  ;;  %v2786_v42 = vrot.slane %v2772_v1, %v5088_v31  ;;  %v2787_v3 = vcombine.high %v2779_v48, %v2779_v48 }
 0x1d9   :  { %v2767_v10 = vrot.slane %v2739_v62, %v5088_v31  ;;  %v2769_v45 = vcombine.high %v2753_v61, %v2753_v61  ;;  %v2770_v60 = vcombine.high %v2760_v56, %v2760_v56  ;;  %v3285_v39 = vmul.f32 %v5446_v8, %v2760_v56 }
 0x1da   :  { %v3286_v28 = vmul.f32 %v5450_v9, %v2768_v57  ;;  %v3288_v19 = vmul.f32 %v5467_v25, %v2753_v61  ;;  %v3931_v22 = vcombine.low %v3283_v5, %v3284_v2  ;;  %v2788_v53 = vcombine.high %v2786_v42, %v2786_v42 }
 0x1db   :  { %v2771_v16 = vcombine.high %v2767_v10, %v2767_v10  ;;  %v3287_v23 = vmul.f32 %v5453_v13, %v2770_v60  ;;  %v3289_v24 = vmul.f32 %v5474_v38, %v2767_v10  ;;  %v3290_v26 = vmul.f32 %v5487_v11, %v2769_v45 }
 0x1dc   :  { %v3932_v27 = vcombine.low %v3285_v39, %v3286_v28  ;;  %v3953_v32 = vrot.slane %v3931_v22, %v5088_v31  ;;  %v2795_v17 = vrot.slane %v2779_v48, %v5088_v31  ;;  %v2802_v30 = vrot.slane %v2786_v42, %v5088_v31 }
 0x1dd   :  { %v3978_v33 = vcombine.low %v3287_v23, %v3288_v19  ;;  %v3979_v34 = vcombine.low %v3289_v24, %v3290_v26  ;;  %v2809_v35 = vrot.slane %v2787_v3, %v5088_v31  ;;  %v2816_v5 = vrot.slane %v2788_v53, %v5088_v31  ;;  %v2199_v15 = vpop.f32.mrb[28].mxu0 }
 0x1de   :  { %v3960_v18 = vrot.slane %v3932_v27, %v5088_v31  ;;  %v2817_v44 = vcombine.high %v2795_v17, %v2795_v17  ;;  %v2818_v1 = vcombine.high %v2802_v30, %v2802_v30  ;;  %v3291_v41 = vmul.f32 %v5460_v20, %v2771_v16  ;;  %v4592_v62 = vpop.f32.mrb[29].mxu0 }
 0x1df   :  { %v3987_v61 = vrot.slane %v3978_v33, %v5088_v31  ;;  %v3994_v48 = vrot.slane %v3979_v34, %v5088_v31  ;;  %v2819_v56 = vcombine.high %v2809_v35, %v2809_v35  ;;  %v2820_v57 = vcombine.high %v2816_v5, %v2816_v5 }
 0x1e0   :  { %v3962_v58 = vcombine.low %v3953_v32, %v3960_v18  ;;  %v3292_v2 = vmul.f32 %v5477_v36, %v2795_v17  ;;  %v3293_v42 = vmul.f32 %v5481_v37, %v2809_v35  ;;  %v3294_v3 = vmul.f32 %v5418_v54, %v2817_v44 }
 0x1e1   :  { %v4009_v10 = vcombine.low %v3987_v61, %v3994_v48  ;;  %v3295_v45 = vmul.f32 %v5421_v50, %v2819_v56  ;;  %v3296_v60 = vmul.f32 %v5436_v63, %v2802_v30  ;;  %v3297_v39 = vmul.f32 %v5440_v0, %v2816_v5  ;;  %v4681_v5 = vld [vmem:[%s5964_s2] ss:$0 sm:$0xff] }
 0x1e2   :  { %v5825_v28 = vrot.slane %v3962_v58, %v5088_v31  ;;  %v3298_v19 = vmul.f32 %v5425_v52, %v2818_v1  ;;  %v3299_v22 = vmul.f32 %v5428_v55, %v2820_v57  ;;  %v3980_v53 = vcombine.low %v3291_v41, %v3292_v2 }
 0x1e3   :  { %v4017_v16 = vrot.slane %v4009_v10, %v5088_v31  ;;  %v4008_v23 = vrot.slane %v3293_v42, %v5088_v31  ;;  %v4026_v24 = vcombine.low %v3294_v3, %v3295_v45  ;;  %v4027_v26 = vcombine.low %v3296_v60, %v3297_v39 }
 0x1e4   :  { %v3977_v27 = vcombine.low %v5788_v47, %v5825_v28  ;;  %v4001_v32 = vrot.slane %v3980_v53, %v5088_v31  ;;  %v4028_v17 = vcombine.low %v3298_v19, %v3299_v22  ;;  %v2828_v30 = vrot.slane %v5778_v4, %v5088_v31 }
 0x1e5   :  { %v4036_v33 = vrot.slane %v4026_v24, %v5088_v31  ;;  %v4043_v34 = vrot.slane %v4027_v26, %v5088_v31  ;;  %v2835_v35 = vrot.slane %v2821_v29, %v5088_v31  ;;  %v2195_v18 = vadd.f32 %v4681_v5, %v5793_v46 }
 0x1e6   :  { %v4010_v44 = vcombine.low %v4001_v32, %v4008_v23  ;;  %v2836_v1 = vcombine.high %v2828_v30, %v2828_v30  ;;  %v2844_v41 = vrot.slane %v2828_v30, %v5088_v31  ;;  %v4050_v62 = vrot.slane %v4028_v17, %v5088_v31 }
 0x1e7   :  { %v4058_v61 = vcombine.low %v4036_v33, %v4043_v34  ;;  %v2837_v48 = vcombine.high %v2835_v35, %v2835_v35  ;;  %v2851_v56 = vrot.slane %v2835_v35, %v5088_v31  ;;  %v2216_v57 = vmax.f32 %v2195_v18, 0.0 }
 0x1e8   :  { %v4024_v4 = vrot.slane %v4010_v44, %v5088_v31  ;;  %v2858_v29 = vrot.slane %v2836_v1, %v5088_v31  ;;  %v2866_v58 = vcombine.high %v2844_v41, %v2844_v41  ;;  %v3300_v2 = vmul.f32 %v5446_v8, %v2844_v41 }
 0x1e9   :  { %v5853_v46 = vrot.slane %v4058_v61, %v5088_v31  ;;  %v2865_v42 = vrot.slane %v2837_v48, %v5088_v31  ;;  %v2867_v3 = vcombine.high %v2851_v56, %v2851_v56  ;;  %v3304_v10 = vmul.f32 %v5474_v38, %v2851_v56 }
 0x1ea   :  { %v5857_v45 = vcombine.low %v4017_v16, %v4024_v4  ;;  %v2868_v60 = vcombine.high %v2858_v29, %v2858_v29  ;;  %v3301_v39 = vmul.f32 %v5450_v9, %v2858_v29  ;;  %v3302_v19 = vmul.f32 %v5453_v13, %v2866_v58 }
 0x1eb   :  { %v2869_v22 = vcombine.high %v2865_v42, %v2865_v42  ;;  %v3305_v53 = vmul.f32 %v5487_v11, %v2865_v42  ;;  %v3306_v23 = vmul.f32 %v5460_v20, %v2867_v3  ;;  %v2870_v24 = vcombine.high %v2216_v57, %v2216_v57 }
 0x1ec   :  { %v3303_v26 = vmul.f32 %v5467_v25, %v2868_v60  ;;  %v4029_v32 = vcombine.low %v3300_v2, %v3301_v39  ;;  %v2877_v17 = vrot.slane %v2216_v57, %v5088_v31  ;;  %v2200_v30 = vadd.f32 %v4681_v5, %v2199_v15 }
 0x1ed   :  { %v3307_v16 = vmul.f32 %v5477_v36, %v2869_v22  ;;  %v4076_v33 = vcombine.low %v3304_v10, %v3305_v53  ;;  %v2884_v34 = vrot.slane %v2870_v24, %v5088_v31  ;;  %v4242_v35 = vrot.slane %v5782_v12, 1 }
 0x1ee   :  { %v4057_v18 = vrot.slane %v4029_v32, %v5088_v31  ;;  %v4075_v44 = vcombine.low %v3302_v19, %v3303_v26  ;;  %v2885_v1 = vcombine.high %v2877_v17, %v2877_v17  ;;  %v2893_v41 = vrot.slane %v2877_v17, %v5088_v31 }
 0x1ef   :  { %v4077_v61 = vcombine.low %v3306_v23, %v3307_v16  ;;  %v4091_v48 = vrot.slane %v4076_v33, %v5088_v31  ;;  %v2886_v56 = vcombine.high %v2884_v34, %v2884_v34  ;;  %v2900_v57 = vrot.slane %v2884_v34, %v5088_v31 }
 0x1f0   :  { %v4059_v15 = vcombine.low %v4050_v62, %v4057_v18  ;;  %v4084_v5 = vrot.slane %v4075_v44, %v5088_v31  ;;  %v2907_v4 = vrot.slane %v2885_v1, %v5088_v31  ;;  %v2915_v29 = vcombine.high %v2893_v41, %v2893_v41 }
 0x1f1   :  { %v2914_v58 = vrot.slane %v2886_v56, %v5088_v31  ;;  %v2916_v2 = vcombine.high %v2900_v57, %v2900_v57  ;;  %v3308_v42 = vmul.f32 %v5481_v37, %v2893_v41  ;;  %v3312_v3 = vmul.f32 %v5440_v0, %v2900_v57 }
 0x1f2   :  { %v5878_v10 = vrot.slane %v4059_v15, %v5088_v31  ;;  %v4106_v60 = vcombine.low %v4084_v5, %v4091_v48  ;;  %v2917_v39 = vcombine.high %v2907_v4, %v2907_v4  ;;  %v3309_v19 = vmul.f32 %v5418_v54, %v2907_v4 }
 0x1f3   :  { %v2918_v62 = vcombine.high %v2914_v58, %v2914_v58  ;;  %v3310_v22 = vmul.f32 %v5421_v50, %v2915_v29  ;;  %v3313_v53 = vmul.f32 %v5425_v52, %v2914_v58  ;;  %v3314_v23 = vmul.f32 %v5428_v55, %v2916_v2 }
 0x1f4   :  { %v3311_v24 = vmul.f32 %v5436_v63, %v2917_v39  ;;  %v4098_v26 = vrot.slane %v4077_v61, %v5088_v31  ;;  %v4105_v0 = vrot.slane %v3308_v42, %v5088_v31  ;;  %v4114_v32 = vrot.slane %v4106_v60, %v5088_v31 }
 0x1f5   :  { %v4123_v17 = vcombine.low %v3309_v19, %v3310_v22  ;;  %v4125_v16 = vcombine.low %v3313_v53, %v3314_v23  ;;  %v2217_v33 = vmax.f32 %v2200_v30, 0.0  ;;  %v3315_v54 = vmul.f32 %v5446_v8, %v2918_v62 }
 0x1f6   :  { %v4107_v34 = vcombine.low %v4098_v26, %v4105_v0  ;;  %v4124_v18 = vcombine.low %v3311_v24, %v3312_v3  ;;  %v4074_v50 = vcombine.low %v5853_v46, %v5878_v10  ;;  %v5892_v52 = vmax.f32 %v5782_v12, %v4242_v35 }
 0x1f7   :  { %v4133_v55 = vrot.slane %v4123_v17, %v5088_v31  ;;  %v2919_v63 = vcombine.high %v2217_v33, %v2217_v33  ;;  %v2926_v44 = vrot.slane %v2217_v33, %v5088_v31  ;;  %v4147_v1 = vrot.slane %v4125_v16, %v5088_v31 }
 0x1f8   :  { %v4121_v41 = vrot.slane %v4107_v34, %v5088_v31  ;;  %v4140_v30 = vrot.slane %v4124_v18, %v5088_v31  ;;  %v4249_v8 = vmax.f32 %v5623_v49, %v4248_v43  ;;  %v4255_v12 = vmax.f32 %v5683_v7, %v4254_v40 }
 0x1f9   :  { %v2933_v46 = vrot.slane %v2919_v63, %v5088_v31  ;;  %v2934_v35 = vcombine.high %v2926_v44, %v2926_v44  ;;  %v2942_v61 = vrot.slane %v2926_v44, %v5088_v31  ;;  %v4262_v48 = vrot.slane %v5737_v21, 4 }
 0x1fa   :  { %v4122_v56 = vcombine.low %v4114_v32, %v4121_v41  ;;  %v4155_v57 = vcombine.low %v4133_v55, %v4140_v30  ;;  %v4250_v15 = vrot.slane %v4249_v8, 1  ;;  %v4256_v5 = vrot.slane %v4255_v12, 2 }
 0x1fb   :  { %v2935_v4 = vcombine.high %v2933_v46, %v2933_v46  ;;  %v2949_v29 = vrot.slane %v2933_v46, %v5088_v31  ;;  %v2956_v49 = vrot.slane %v2934_v35, %v5088_v31  ;;  %v2964_v43 = vcombine.high %v2942_v61, %v2942_v61 }
 0x1fc   :  { %v3316_v58 = vmul.f32 %v5450_v9, %v2942_v61  ;;  %v5912_v7 = vrot.slane %v4155_v57, %v5088_v31  ;;  %v4251_v40 = vmax.f32 %v4249_v8, %v4250_v15  ;;  %v4257_v2 = vmax.f32 %v4255_v12, %v4256_v5 }
 0x1fd   :  { %v2963_v42 = vrot.slane %v2935_v4, %v5088_v31  ;;  %v2965_v3 = vcombine.high %v2949_v29, %v2949_v29  ;;  %v2966_v10 = vcombine.high %v2956_v49, %v2956_v49  ;;  %v3317_v60 = vmul.f32 %v5453_v13, %v2956_v49 }
 0x1fe   :  { %v3318_v39 = vmul.f32 %v5467_v25, %v2964_v43  ;;  %v3320_v19 = vmul.f32 %v5487_v11, %v2949_v29  ;;  %v4126_v62 = vcombine.low %v3315_v54, %v3316_v58  ;;  %v4258_v22 = vrot.slane %v4257_v2, 1 }
 0x1ff   :  { %v2967_v53 = vcombine.high %v2963_v42, %v2963_v42  ;;  %v3319_v9 = vmul.f32 %v5474_v38, %v2966_v10  ;;  %v3321_v23 = vmul.f32 %v5460_v20, %v2963_v42  ;;  %v3322_v24 = vmul.f32 %v5477_v36, %v2965_v3 }
 0x200   :  { %v4154_v26 = vrot.slane %v4126_v62, %v5088_v31  ;;  %v4172_v0 = vcombine.low %v3317_v60, %v3318_v39  ;;  %v4259_v32 = vmax.f32 %v4257_v2, %v4258_v22  ;;  %v4263_v17 = vmax.f32 %v5737_v21, %v4262_v48 }
 0x201   :  { %v3323_v13 = vmul.f32 %v5481_v37, %v2967_v53  ;;  %v4173_v25 = vcombine.low %v3319_v9, %v3320_v19  ;;  %v4174_v16 = vcombine.low %v3321_v23, %v3322_v24  ;;  %v4269_v11 = vmax.f32 %v3880_v14, %v5798_v59  ;;  %v4483_v9 = vld [vmem:[%s5967_s5] ss:$0 sm:$0xff]  ;;  %s4682_s5 = scalar_lea.vmem %s4448_s30, 128 }
 0x202   :  { %v4156_v38 = vcombine.low %v4147_v1, %v4154_v26  ;;  %v4181_v20 = vrot.slane %v4172_v0, %v5088_v31  ;;  %v4264_v33 = vrot.slane %v4263_v17, 2  ;;  %v4276_v36 = vsel %vm72_vm1, %v5857_v45, -inf  ;;  %v4484_v0 = vld [vmem:[%s5968_s6] ss:$0 sm:$0xff]  ;;  %p4683_p0 = scmp.ne.s32.totalorder %s4448_s30, %s4682_s5  ;;  %p4688_p2 = scmp.lt.s32.totalorder %s4682_s5, %s4682_s5 }
 0x203   :  { %v4188_v54 = vrot.slane %v4173_v25, %v5088_v31  ;;  %v4195_v21 = vrot.slane %v4174_v16, %v5088_v31  ;;  %v4202_v37 = vrot.slane %v3323_v13, %v5088_v31  ;;  %v4270_v34 = vrot.slane %v4269_v11, 4  ;;  %v4485_v25 = vld [vmem:[#allocation2] ss:$0 sm:$0xff] }
 0x204   :  { %v4170_v18 = vrot.slane %v4156_v38, %v5088_v31  ;;  %v4265_v55 = vmax.f32 %v4263_v17, %v4264_v33  ;;  %v4277_v51 = vmax.f32 %v3977_v27, %v4276_v36  ;;  %v4284_v6 = vsel %vm72_vm1, %v4122_v56, -inf  ;;  %p4689_p3 = por %p4688_p2, %p4687_p1 }
 0x205   :  { %v4203_v14 = vcombine.low %v4181_v20, %v4188_v54  ;;  %v4204_v59 = vcombine.low %v4195_v21, %v4202_v37  ;;  %v4271_v63 = vmax.f32 %v4269_v11, %v4270_v34  ;;  %v4285_v45 = vmax.f32 %v4074_v50, %v4284_v6 }
 0x206   :  { %v4171_v44 = vcombine.low %v5912_v7, %v4170_v18  ;;  %v4266_v1 = vrot.slane %v4265_v55, 1  ;;  %v4278_v41 = vrot.slane %v4277_v51, 4  ;;  %v4332_v28 = vsel %vm4331_vm10, %v4251_v40, %v5892_v52  ;;  %p4690_p4 = pnand %p4689_p3, %p4683_p0 }
 0x207   :  { %v4211_v30 = vrot.slane %v4203_v14, %v5088_v31  ;;  %v4218_v8 = vrot.slane %v4204_v59, %v5088_v31  ;;  %v4272_v12 = vrot.slane %v4271_v63, 2  ;;  %v4286_v46 = vrot.slane %v4285_v45, 4 }
 0x208   :  { %v4267_v35 = vmax.f32 %v4265_v55, %v4266_v1  ;;  %v4279_v47 = vmax.f32 %v4277_v51, %v4278_v41  ;;  %v4334_v50 = vsel %vm4333_vm11, %v4259_v32, %v4332_v28  ;;  %v4714_v13 = vmov 0  }
 0x209   :  { %v4219_v27 = vcombine.low %v4211_v30, %v4218_v8  ;;  %v4273_v61 = vmax.f32 %v4271_v63, %v4272_v12  ;;  %v4287_v48 = vmax.f32 %v4285_v45, %v4286_v46  ;;  %4677 = vset.pattern.permute.xlu1 %v4714_v13  ;;  %4678 = vset.pattern.permute.xlu0 %v4714_v13 }
 0x20a   :  { %v4280_v56 = vrot.slane %v4279_v47, 2  ;;  %v4336_v4 = vsel %vm4335_vm12, %v4267_v35, %v4334_v50 }
 0x20b   :  { %v4274_v57 = vrot.slane %v4273_v61, 1  ;;  %v4288_v15 = vrot.slane %v4287_v48, 2  ;;  %v4292_v5 = vsel %vm72_vm1, %v4219_v27, -inf }
 0x20c   :  { %v4281_v29 = vmax.f32 %v4279_v47, %v4280_v56  ;;  %v4293_v31 = vmax.f32 %v4171_v44, %v4292_v5 }
 0x20d   :  { %v4275_v49 = vmax.f32 %v4273_v61, %v4274_v57  ;;  %v4289_v43 = vmax.f32 %v4287_v48, %v4288_v15 }
 0x20e   :  { %v4282_v58 = vrot.slane %v4281_v29, 1  ;;  %v4294_v7 = vrot.slane %v4293_v31, 4 }
 0x20f   :  { %v4290_v52 = vrot.slane %v4289_v43, 1  ;;  %v4338_v40 = vsel %vm4337_vm13, %v4275_v49, %v4336_v4 }
 0x210   :  { %v4283_v2 = vmax.f32 %v4281_v29, %v4282_v58  ;;  %v4295_v42 = vmax.f32 %v4293_v31, %v4294_v7 }
 0x211   :  { %v4291_v3 = vmax.f32 %v4289_v43, %v4290_v52 }
 0x212   :  { %v4296_v10 = vrot.slane %v4295_v42, 2  ;;  %v4340_v60 = vsel %vm4339_vm14, %v4283_v2, %v4338_v40 }
 0x213   :  { %v4342_v39 = vsel %vm4341_vm15, %v4291_v3, %v4340_v60 }
 0x214   :  { %v4297_v19 = vmax.f32 %v4295_v42, %v4296_v10 }
 0x216   :  { %v4298_v62 = vrot.slane %v4297_v19, 1 }
 0x218   :  { %v4299_v22 = vmax.f32 %v4297_v19, %v4298_v62 }
 0x21a   :  { %v4344_v53 = vsel %vm4343_vm0, %v4299_v22, %v4342_v39 }
 0x21b   :  { %4626 = vmatmul.mubr.f32.vlgmr.msra.gmra.mrb[0].mxu1 %v4344_v53 }
 0x2ee   :  { %v4412_v23 = vpop.f32.mrb[0].mxu1 }
 0x2ef   :  { %v4413_v24 = vadd.f32 %v4483_v9, %v4412_v23  ;;  %v4627_v26 = vpop.f32.mrb[1].mxu1 }
 0x2f1   :  { %v4416_v32 = vmax.f32 %v4413_v24, 0.0 }
 0x2f3   :  { %v4424_v17 = vmul.f32 %v4484_v0, %v4416_v32 }
 0x2f5   :  { %4425 = vadd.xlane.f32.xlu0 %v4424_v17 }
 0x382   :  { %v4426_v16 = vpop.xlane.xlu0 %4425 }
 0x383   :  { %v4434_v11 = vadd.f32 %v4485_v25, %v4426_v16 }
 0x385   :  { %4437 = vperm.xlu1 %4677, %v4434_v11  }
 0x404   :  { %v4438_v38 = vpop.permute.xlu1 %4437 }
 0x405   :  { %4440 = vst [vmem:[#allocation3] sm:$0xff] %v4438_v38 }
 0x406   :  { %4693 = shalt.err (!%p4690_p4)
}
 0x407   :  { %s4694_s10 = scalar_lea.hbm %s5970_s8, 128 }
 0x408   :  { %p4695_p5 = scmp.ne.s32.totalorder %s5970_s8, %s4694_s10  ;;  %p4698_p6 = scmp.lt.u32.totalorder %s4694_s10, %s5970_s8 }
 0x40a   :  { %p4700_p7 = pnand %p4698_p6, %p4695_p5 }
 0x40c   :  { %4703 = shalt.err (!%p4700_p7)
}
 0x40d   :  { %4450 = dma.vmem_to_hbm [thread:$0]  %s4448_s30, 128, %s5970_s8, [#allocation4]  }
 0x40e   :  { %4704 = dma.done.wait [#allocation4], 128  }
 0x40f   :  { %4705 = vsyncadd [#allocation4], 4294967168 }
 0x410   :  { %4454 = vsyncpa [#allocation4], 1 }

</bundles_post_ra>
